<compile_context>
chip_gen: v5e
topology: v5e:2x2
jax: 0.10.0
libtpu: 0.0.40
codegen_flags: <defaults>
</compile_context>

<pallas_src>
import functools

import jax
import jax.numpy as jnp
import numpy as np
from jax.experimental import pallas as pl
from jax.experimental.pallas import tpu as pltpu

# ---------------- static module configuration ----------------
C_HID = 16            # hidden channels
C_OUT = 3             # readout channels
COUT_PAD = 8          # readout channels padded for a lane-dense store
GROUPS = 2            # GroupNorm groups
CPG = C_HID // GROUPS # channels per group (8)
H_IN, W_IN = 8, 8     # hid spatial size
H_OUT, W_OUT = 2 * H_IN, 2 * W_IN

LANES_HID = W_IN * C_HID          # 128  (hid,   (W*C) natural layout)
LANES_FULL = W_OUT * C_HID        # 256  (16x16 activations, group-major layout)
LANES_GRP = LANES_FULL // GROUPS  # 128  lanes per GroupNorm group
LANES_OUT = W_OUT * COUT_PAD      # 128  (readout rows)


# =====================================================================================
# Fused decoder kernel (TB batch samples per grid step)
# =====================================================================================
def _simvp_decoder_kernel(xh_ref, xe_ref, w0_ref, p_ref, w1_ref, wr_ref,
                          v6_ref, br_ref, o_ref, *, neg_slope, eps):
    f32 = jnp.float32
    bf16 = jnp.bfloat16
    dot = functools.partial(jnp.dot, preferred_element_type=f32)
    TB = xh_ref.shape[0]

    def gn_lrelu(h, gamma, beta):
        # Per-sample GroupNorm(2, C) + LeakyReLU.  Lanes are group-major, so group 0 is
        # lanes [0,128) and group 1 is lanes [128,256): plain slicing reductions, no masks.
        # Single pass: var = E[x^2] - mean^2.
        rows = h.shape[1]
        n = float(rows * LANES_GRP)
        rs = jnp.sum(h, axis=1, keepdims=True)            # (TB, 1, 256)
        rq = jnp.sum(h * h, axis=1, keepdims=True)        # (TB, 1, 256)
        s0 = jnp.sum(rs[:, :, :LANES_GRP], axis=2, keepdims=True)   # (TB, 1, 1)
        s1 = jnp.sum(rs[:, :, LANES_GRP:], axis=2, keepdims=True)
        q0 = jnp.sum(rq[:, :, :LANES_GRP], axis=2, keepdims=True)
        q1 = jnp.sum(rq[:, :, LANES_GRP:], axis=2, keepdims=True)
        m0 = s0 / n
        m1 = s1 / n
        i0 = jax.lax.rsqrt(q0 / n - m0 * m0 + eps)
        i1 = jax.lax.rsqrt(q1 / n - m1 * m1 + eps)
        left = jax.lax.broadcasted_iota(jnp.int32, (1, 1, LANES_FULL), 2) < LANES_GRP
        mean = jnp.where(left, m0, m1)                    # (TB, 1, 256)
        inv = jnp.where(left, i0, i1)
        scale = inv * gamma.reshape(1, 1, LANES_FULL)
        shift = beta.reshape(1, 1, LANES_FULL) - mean * scale
        y = h * scale + shift
        return jnp.where(y > 0, y, neg_slope * y)

    # ---- dec[0]: ConvTranspose2d(16,16,3,s=2,p=1,op=1) via sub-pixel row phases -------
    #   ev[i] = output row 2i   (kernel row kh=1, input row i)
    #   od[i] = output row 2i+1 (kh=2 from row i, kh=0 from row i+1; row 8 is the zero pad)
    xa = xh_ref[:, 0:H_IN, :].reshape(TB * H_IN, LANES_HID).astype(bf16)       # rows i
    xb = xh_ref[:, 1:H_IN + 1, :].reshape(TB * H_IN, LANES_HID).astype(bf16)   # rows i+1
    b0 = v6_ref[0:1, :]
    ev = dot(xa, w0_ref[0]) + b0                                  # (TB*8, 256) f32
    od = dot(xa, w0_ref[1]) + dot(xb, w0_ref[2]) + b0             # (TB*8, 256) f32

    # per-sample row layout: [ev rows 0..7, od rows 0..7]  (the P matrices expect this)
    h = jnp.concatenate([ev.reshape(TB, H_IN, LANES_FULL),
                         od.reshape(TB, H_IN, LANES_FULL)], axis=1)   # (TB, 16, 256)
    h = gn_lrelu(h, v6_ref[1:2, :], v6_ref[2:3, :])

    # ---- dec[1]: Conv2d(32,16,3,1,1) on cat([hid0, enc1]) ------------------------------
    # cat is never materialized: the weight is split into hid / enc halves.  Row fetch
    # (interleave for hid0, shift for enc1) is a block-diagonal 0/1 permutation matmul.
    hs = h.reshape(TB * H_OUT, LANES_FULL).astype(bf16)
    xe = xe_ref[...].reshape(TB * H_OUT, LANES_FULL).astype(bf16)
    z = v6_ref[3:4, :]                                            # dec1 bias row (1, 256)
    for dh in range(3):
        gh = dot(p_ref[dh], hs).astype(bf16)                      # hid0 rows q-1+dh
        ge = dot(p_ref[3 + dh], xe).astype(bf16)                  # enc1 rows q-1+dh
        z = z + dot(gh, w1_ref[dh]) + dot(ge, w1_ref[3 + dh])

    z = gn_lrelu(z.reshape(TB, H_OUT, LANES_FULL), v6_ref[4:5, :], v6_ref[5:6, :])

    # ---- readout: Conv2d(16, 3, 1), output channels padded 3 -> 8 (lane-dense store) ---
    y = dot(z.reshape(TB * H_OUT, LANES_FULL).astype(bf16), wr_ref[...]) + br_ref[...]
    o_ref[...] = y.reshape(TB, H_OUT, LANES_OUT).astype(o_ref.dtype)


def _build_pallas_decoder(bpad, tb, dtype):
    kernel = functools.partial(_simvp_decoder_kernel, neg_slope=0.2, eps=1e-5)
    return pl.pallas_call(
        kernel,
        out_shape=jax.ShapeDtypeStruct((bpad, H_OUT, LANES_OUT), dtype),
        grid=(bpad // tb,),
        in_specs=[
            pl.BlockSpec((tb, H_IN + 1, LANES_HID), lambda b: (b, 0, 0)),      # hid (padded row)
            pl.BlockSpec((tb, H_OUT, LANES_FULL), lambda b: (b, 0, 0)),        # enc1
            pl.BlockSpec((3, LANES_HID, LANES_FULL), lambda b: (0, 0, 0)),     # W0  (bf16)
            pl.BlockSpec((6, tb * H_OUT, tb * H_OUT), lambda b: (0, 0, 0)),    # P   (bf16)
            pl.BlockSpec((6, LANES_FULL, LANES_FULL), lambda b: (0, 0, 0)),    # W1  (bf16)
            pl.BlockSpec((LANES_FULL, LANES_OUT), lambda b: (0, 0)),           # WR  (bf16)
            pl.BlockSpec((6, LANES_FULL), lambda b: (0, 0)),                   # V6  (f32)
            pl.BlockSpec((1, LANES_OUT), lambda b: (0, 0)),                    # BR  (f32)
        ],
        out_specs=pl.BlockSpec((tb, H_OUT, LANES_OUT), lambda b: (b, 0, 0)),
        compiler_params=pltpu.CompilerParams(dimension_semantics=("parallel",)),
    )


# =====================================================================================
# Host-side (one-time) parameter refolding into lane-dense, group-major matmul weights
# =====================================================================================
def _choose_tb(batch):
    if batch >= 16:
        return 8                      # TB=8 bounds the (TB*16)^2 permutation-matmul cost
    if batch >= 2:
        return (batch + 1) // 2       # grid length 2 -> feeds both v7x TensorCores
    return 1


def prepare_params(p, tb):
    C = C_HID
    wt0 = np.asarray(p['wt0'], np.float32)   # ConvTranspose2d weight: (Cin, Cout, 3, 3)
    w1 = np.asarray(p['w1'], np.float32)     # Conv2d weight:          (Cout, 2*C, 3, 3)
    wr = np.asarray(p['wr'], np.float32)     # readout weight:         (C_out, C, 1, 1)

    # group-major lane permutation: new lane l = g*128 + w*8 + cg  <-  natural lane w*16 + c
    idx = np.zeros(LANES_FULL, np.int64)
    for l in range(LANES_FULL):
        g, rem = divmod(l, LANES_GRP)
        w, cg = divmod(rem, CPG)
        idx[l] = w * C + g * CPG + cg

    # dec0: fold sub-pixel column taps into 3 dense (128, 256) matrices:
    #   [0] even output rows (kh=1, input row i)
    #   [1] odd  output rows (kh=2, input row i)
    #   [2] odd  output rows (kh=0, input row i+1)
    # The "input col j+1" tap at j=7 hits the all-zero pad column and is dropped (exact).
    W0 = np.zeros((3, LANES_HID, LANES_FULL), np.float32)
    for k, kh in ((0, 1), (1, 2), (2, 0)):
        for j in range(W_IN):
            W0[k, j * C:(j + 1) * C, (2 * j) * C:(2 * j + 1) * C] += wt0[:, :, kh, 1]
            if j + 1 < W_IN:
                W0[k, (j + 1) * C:(j + 2) * C, (2 * j + 1) * C:(2 * j + 2) * C] += wt0[:, :, kh, 0]
            W0[k, j * C:(j + 1) * C, (2 * j + 1) * C:(2 * j + 2) * C] += wt0[:, :, kh, 2]
    W0 = W0[:, :, idx]                       # output lanes -> group-major

    # dec1: per kernel-row folded weights; channel concat split into hid / enc halves.
    W1 = np.zeros((6, LANES_FULL, LANES_FULL), np.float32)
    for dh in range(3):
        for wo in range(W_OUT):
            for kw in range(3):
                wi = wo - 1 + kw
                if 0 <= wi < W_OUT:
                    W1[dh, wi * C:(wi + 1) * C, wo * C:(wo + 1) * C] += w1[:, :C, dh, kw].T
                    W1[3 + dh, wi * C:(wi + 1) * C, wo * C:(wo + 1) * C] += w1[:, C:, dh, kw].T
    W1[:3] = W1[:3][:, idx, :]               # hid-half input lanes are group-major
    W1 = W1[:, :, idx]                       # output lanes -> group-major

    # per-sample 0/1 permutation blocks (hid0 interleave row-fetch / enc1 row-shift),
    # expanded block-diagonally for TB samples per grid step.
    Ps = np.zeros((6, H_OUT, H_OUT), np.float32)
    for dh in range(3):
        for q in range(H_OUT):
            r = q - 1 + dh
            if 0 <= r < H_OUT:
                Ps[dh, q, r // 2 + (H_OUT // 2) * (r % 2)] = 1.0   # hid0: [ev rows, od rows]
                Ps[3 + dh, q, r] = 1.0                             # enc1: natural rows
    eye = np.eye(tb, dtype=np.float32)
    P = np.stack([np.kron(eye, Ps[k]) for k in range(6)], axis=0)  # (6, tb*16, tb*16)

    # readout 1x1 conv, output channels padded 3 -> 8 for a lane-dense store.
    WR = np.zeros((LANES_FULL, LANES_OUT), np.float32)
    wr2 = wr[:, :, 0, 0]                                           # (C_out, C)
    for w in range(W_OUT):
        WR[w * C:(w + 1) * C, w * COUT_PAD:w * COUT_PAD + C_OUT] += wr2.T
    WR = WR[idx, :]                         # input lanes -> group-major

    def row(v):
        return np.tile(np.asarray(v, np.float32), W_OUT)[idx]      # (C,) -> group-major (256,)

    V6 = np.stack([row(p['b0']), row(p['g0']), row(p['be0']),
                   row(p['b1']), row(p['g1']), row(p['be1'])], 0)
    BR = np.zeros((1, LANES_OUT), np.float32)
    for w in range(W_OUT):
        BR[0, w * COUT_PAD:w * COUT_PAD + C_OUT] = np.asarray(p['br'], np.float32)

    wdt = jnp.bfloat16                      # MXU operands in bf16; 0/1 permutations are exact
    return {'W0': jnp.asarray(W0, wdt), 'P': jnp.asarray(P, wdt),
            'W1': jnp.asarray(W1, wdt), 'WR': jnp.asarray(WR, wdt),
            'V6': jnp.asarray(V6, jnp.float32), 'BR': jnp.asarray(BR, jnp.float32)}


# =====================================================================================
# Public forward (accepts / returns PyTorch-style NCHW tensors)
# =====================================================================================
def simvp_decoder_forward(prep, hid_nchw, enc1_nchw):
    B, C, H, W = hid_nchw.shape
    assert (C, H, W) == (C_HID, H_IN, W_IN), (C, H, W)
    assert enc1_nchw.shape == (B, C_HID, H_OUT, W_OUT), enc1_nchw.shape

    tb = prep['P'].shape[1] // H_OUT           # TB the prepared params were built for (static)
    bpad = pl.cdiv(B, tb) * tb

    # NCHW -> lane-dense (H, W*C); one zero row appended for the "input row i+1" taps;
    # zero-pad the batch up to a multiple of TB (extra samples are discarded after the call).
    xh = jnp.transpose(hid_nchw, (0, 2, 3, 1)).reshape(B, H_IN, LANES_HID)
    xh = jnp.pad(xh, ((0, bpad - B), (0, 1), (0, 0)))                 # (bpad, 9, 128)
    xe = jnp.transpose(enc1_nchw, (0, 2, 3, 1)).reshape(B, H_OUT, LANES_FULL)
    xe = jnp.pad(xe, ((0, bpad - B), (0, 0), (0, 0)))                 # (bpad, 16, 256)

    y = _build_pallas_decoder(bpad, tb, hid_nchw.dtype)(
        xh, xe, prep['W0'], prep['P'], prep['W1'], prep['WR'], prep['V6'], prep['BR'])

    # (bpad, 16, 128) -> (B, 16, 16, 8) -> keep 3 real channels -> NCHW
    y = y[:B].reshape(B, H_OUT, W_OUT, COUT_PAD)[..., :C_OUT]
    # TODO(synk): an NHWC-consuming downstream could take `y` directly and skip this relayout.
    return jnp.transpose(y, (0, 3, 1, 2))


# =====================================================================================
# Parameters + pure-JAX (XLA) reference for validation
# =====================================================================================
def init_params(key, C_hid, C_out):
    ks = jax.random.split(key, 10)

    def nrm(k, shape, scale=0.1):
        return scale * jax.random.normal(k, shape, jnp.float32)

    p = {}
    p['wt0'] = nrm(ks[0], (C_hid, C_hid, 3, 3))          # ConvTranspose2d (in, out, kh, kw)
    p['b0'] = nrm(ks[1], (C_hid,))
    p['g0'] = 1.0 + nrm(ks[2], (C_hid,))
    p['be0'] = nrm(ks[3], (C_hid,))
    p['w1'] = nrm(ks[4], (C_hid, 2 * C_hid, 3, 3))       # Conv2d (out, in, kh, kw)
    p['b1'] = nrm(ks[5], (C_hid,))
    p['g1'] = 1.0 + nrm(ks[6], (C_hid,))
    p['be1'] = nrm(ks[7], (C_hid,))
    p['wr'] = nrm(ks[8], (C_out, C_hid, 1, 1))
    p['br'] = nrm(ks[9], (C_out,))
    return p


def _ref_gn_lrelu(y, gamma, beta, groups=2, eps=1e-5, slope=0.2):
    B, C, H, W = y.shape
    yg = y.reshape(B, groups, C // groups, H, W)
    mu = yg.mean(axis=(2, 3, 4), keepdims=True)
    var = jnp.square(yg - mu).mean(axis=(2, 3, 4), keepdims=True)
    yg = (yg - mu) / jnp.sqrt(var + eps)
    y = yg.reshape(B, C, H, W) * gamma[None, :, None, None] + beta[None, :, None, None]
    return jnp.where(y > 0, y, slope * y)


def ref_forward(p, hid, enc1):
    dn = ('NCHW', 'OIHW', 'NCHW')
    prec = jax.lax.Precision.HIGHEST
    # ConvTranspose2d(k=3, s=2, p=1, output_padding=1) == dilated conv with flipped kernel
    w0 = jnp.transpose(jnp.flip(p['wt0'], axis=(2, 3)), (1, 0, 2, 3))
    h = jax.lax.conv_general_dilated(hid, w0, (1, 1), [(1, 2), (1, 2)],
                                     lhs_dilation=(2, 2), dimension_numbers=dn,
                                     precision=prec)
    h = h + p['b0'][None, :, None, None]
    h = _ref_gn_lrelu(h, p['g0'], p['be0'])
    h = jnp.concatenate([h, enc1], axis=1)
    h2 = jax.lax.conv_general_dilated(h, p['w1'], (1, 1), [(1, 1), (1, 1)],
                                      dimension_numbers=dn, precision=prec)
    h2 = h2 + p['b1'][None, :, None, None]
    h2 = _ref_gn_lrelu(h2, p['g1'], p['be1'])
    y = jax.lax.conv_general_dilated(h2, p['wr'], (1, 1), [(0, 0), (0, 0)],
                                     dimension_numbers=dn, precision=prec)
    return y + p['br'][None, :, None, None]


if __name__ == "__main__":
    key = jax.random.PRNGKey(0)
    kp, kdata = jax.random.split(key)
    params = init_params(kp, C_HID, C_OUT)

    fwd = jax.jit(simvp_decoder_forward)

    # B=2 exercises the TB=1 path (grid of 2 for v7x); B=5 exercises TB>1 batch blocking
    # plus batch padding (pads to 6, TB=3, grid of 2).
    for B in (2, 5):
        kh, ke = jax.random.split(jax.random.fold_in(kdata, B))
        hid = jax.random.normal(kh, (B, C_HID, H_IN, W_IN), jnp.float32)        # NCHW
        enc1 = jax.random.normal(ke, (B, C_HID, H_OUT, W_OUT), jnp.float32)

        prep = prepare_params(params, _choose_tb(B))     # host-side, once per TB config
        out = jax.block_until_ready(fwd(prep, hid, enc1))
        assert out.shape == (B, C_OUT, H_OUT, W_OUT), out.shape

        ref = ref_forward(params, hid, enc1)
        # Tolerance covers bf16 MXU operands (f32 accumulation / f32 GN math).
        np.testing.assert_allclose(np.asarray(out), np.asarray(ref), rtol=2e-2, atol=2e-2)

    print("KERNEL_OK")
</pallas_src>

<mosaic_0001>
module attributes {stable_mosaic.version = 11 : i64} {
  func.func @_simvp_decoder_kernel(%arg0: i32, %arg1: memref<1x9x128xf32, #tpu.memory_space<vmem>>, %arg2: memref<1x16x256xf32, #tpu.memory_space<vmem>>, %arg3: memref<3x128x256xbf16, #tpu.memory_space<vmem>>, %arg4: memref<6x16x16xbf16, #tpu.memory_space<vmem>>, %arg5: memref<6x256x256xbf16, #tpu.memory_space<vmem>>, %arg6: memref<256x128xbf16, #tpu.memory_space<vmem>>, %arg7: memref<6x256xf32, #tpu.memory_space<vmem>>, %arg8: memref<1x128xf32, #tpu.memory_space<vmem>>, %arg9: memref<1x16x128xf32, #tpu.memory_space<vmem>>) attributes {dimension_semantics = [#tpu.dimension_semantics<parallel>], iteration_bounds = array<i64: 2>, scalar_prefetch = 0 : i64, scratch_operands = 0 : i64, tpu.core_type = #tpu.core_type<tc>, window_params = [{transform_indices = @transform_0, window_bounds = array<i64: 1, 9, 128>}, {transform_indices = @transform_1, window_bounds = array<i64: 1, 16, 256>}, {pipeline_mode = #tpu.pipeline_mode<synchronous>, transform_indices = @transform_2, window_bounds = array<i64: 3, 128, 256>}, {pipeline_mode = #tpu.pipeline_mode<synchronous>, transform_indices = @transform_3, window_bounds = array<i64: 6, 16, 16>}, {pipeline_mode = #tpu.pipeline_mode<synchronous>, transform_indices = @transform_4, window_bounds = array<i64: 6, 256, 256>}, {pipeline_mode = #tpu.pipeline_mode<synchronous>, transform_indices = @transform_5, window_bounds = array<i64: 256, 128>}, {pipeline_mode = #tpu.pipeline_mode<synchronous>, transform_indices = @transform_6, window_bounds = array<i64: 6, 256>}, {pipeline_mode = #tpu.pipeline_mode<synchronous>, transform_indices = @transform_7, window_bounds = array<i64: 1, 128>}, {transform_indices = @transform_8, window_bounds = array<i64: 1, 16, 128>}]} {
    %c0 = arith.constant 0 : index
    %c0_0 = arith.constant 0 : index
    %c0_1 = arith.constant 0 : index
    %0 = vector.load %arg1[%c0, %c0_0, %c0_1] : memref<1x9x128xf32, #tpu.memory_space<vmem>>, vector<1x8x128xf32>
    %1 = vector.shape_cast %0 : vector<1x8x128xf32> to vector<8x128xf32>
    %2 = arith.truncf %1 : vector<8x128xf32> to vector<8x128xbf16>
    %c0_2 = arith.constant 0 : index
    %c1 = arith.constant 1 : index
    %c0_3 = arith.constant 0 : index
    %3 = vector.load %arg1[%c0_2, %c1, %c0_3] : memref<1x9x128xf32, #tpu.memory_space<vmem>>, vector<1x8x128xf32>
    %4 = vector.shape_cast %3 : vector<1x8x128xf32> to vector<8x128xf32>
    %5 = arith.truncf %4 : vector<8x128xf32> to vector<8x128xbf16>
    %c0_4 = arith.constant 0 : index
    %c0_5 = arith.constant 0 : index
    %6 = vector.load %arg7[%c0_4, %c0_5] : memref<6x256xf32, #tpu.memory_space<vmem>>, vector<1x256xf32>
    %c0_6 = arith.constant 0 : index
    %c0_7 = arith.constant 0 : index
    %c0_8 = arith.constant 0 : index
    %7 = vector.load %arg3[%c0_6, %c0_7, %c0_8] : memref<3x128x256xbf16, #tpu.memory_space<vmem>>, vector<1x128x256xbf16>
    %8 = vector.shape_cast %7 : vector<1x128x256xbf16> to vector<128x256xbf16>
    %cst = arith.constant dense<0.000000e+00> : vector<8x256xf32>
    %9 = tpu.matmul %2, %8, %cst {dimension_numbers = #tpu.dot_dimension_numbers<[1], [0], [0], [1], [0, 0, 1, 1], [], []>} : vector<8x128xbf16>, vector<128x256xbf16>, vector<8x256xf32> -> vector<8x256xf32>
    %10 = vector.broadcast %6 : vector<1x256xf32> to vector<8x256xf32>
    %11 = arith.addf %9, %10 : vector<8x256xf32>
    %c1_9 = arith.constant 1 : index
    %c0_10 = arith.constant 0 : index
    %c0_11 = arith.constant 0 : index
    %12 = vector.load %arg3[%c1_9, %c0_10, %c0_11] : memref<3x128x256xbf16, #tpu.memory_space<vmem>>, vector<1x128x256xbf16>
    %13 = vector.shape_cast %12 : vector<1x128x256xbf16> to vector<128x256xbf16>
    %cst_12 = arith.constant dense<0.000000e+00> : vector<8x256xf32>
    %14 = tpu.matmul %2, %13, %cst_12 {dimension_numbers = #tpu.dot_dimension_numbers<[1], [0], [0], [1], [0, 0, 1, 1], [], []>} : vector<8x128xbf16>, vector<128x256xbf16>, vector<8x256xf32> -> vector<8x256xf32>
    %c2 = arith.constant 2 : index
    %c0_13 = arith.constant 0 : index
    %c0_14 = arith.constant 0 : index
    %15 = vector.load %arg3[%c2, %c0_13, %c0_14] : memref<3x128x256xbf16, #tpu.memory_space<vmem>>, vector<1x128x256xbf16>
    %16 = vector.shape_cast %15 : vector<1x128x256xbf16> to vector<128x256xbf16>
    %cst_15 = arith.constant dense<0.000000e+00> : vector<8x256xf32>
    %17 = tpu.matmul %5, %16, %cst_15 {dimension_numbers = #tpu.dot_dimension_numbers<[1], [0], [0], [1], [0, 0, 1, 1], [], []>} : vector<8x128xbf16>, vector<128x256xbf16>, vector<8x256xf32> -> vector<8x256xf32>
    %18 = arith.addf %14, %17 : vector<8x256xf32>
    %19 = vector.broadcast %6 : vector<1x256xf32> to vector<8x256xf32>
    %20 = arith.addf %18, %19 : vector<8x256xf32>
    %21 = vector.shape_cast %11 : vector<8x256xf32> to vector<1x8x256xf32>
    %22 = vector.shape_cast %20 : vector<8x256xf32> to vector<1x8x256xf32>
    %23 = tpu.concatenate %21, %22 in 1 : vector<1x8x256xf32>, vector<1x8x256xf32> -> vector<1x16x256xf32>
    %c1_16 = arith.constant 1 : index
    %c0_17 = arith.constant 0 : index
    %24 = vector.load %arg7[%c1_16, %c0_17] : memref<6x256xf32, #tpu.memory_space<vmem>>, vector<1x256xf32>
    %c2_18 = arith.constant 2 : index
    %c0_19 = arith.constant 0 : index
    %25 = vector.load %arg7[%c2_18, %c0_19] : memref<6x256xf32, #tpu.memory_space<vmem>>, vector<1x256xf32>
    %cst_20 = arith.constant dense<0.000000e+00> : vector<1x256xf32>
    %26 = vector.multi_reduction <add>, %23, %cst_20 [1] : vector<1x16x256xf32> to vector<1x256xf32>
    %27 = vector.shape_cast %26 : vector<1x256xf32> to vector<1x1x256xf32>
    %28 = arith.mulf %23, %23 : vector<1x16x256xf32>
    %cst_21 = arith.constant dense<0.000000e+00> : vector<1x256xf32>
    %29 = vector.multi_reduction <add>, %28, %cst_21 [1] : vector<1x16x256xf32> to vector<1x256xf32>
    %30 = vector.shape_cast %29 : vector<1x256xf32> to vector<1x1x256xf32>
    %31 = vector.extract_strided_slice %27 {offsets = [0, 0, 0], sizes = [1, 1, 128], strides = [1, 1, 1]} : vector<1x1x256xf32> to vector<1x1x128xf32>
    %cst_22 = arith.constant dense<0.000000e+00> : vector<1x1xf32>
    %32 = vector.multi_reduction <add>, %31, %cst_22 [2] : vector<1x1x128xf32> to vector<1x1xf32>
    %33 = vector.shape_cast %32 : vector<1x1xf32> to vector<1x1x1xf32>
    %34 = vector.extract_strided_slice %27 {offsets = [0, 0, 128], sizes = [1, 1, 128], strides = [1, 1, 1]} : vector<1x1x256xf32> to vector<1x1x128xf32>
    %cst_23 = arith.constant dense<0.000000e+00> : vector<1x1xf32>
    %35 = vector.multi_reduction <add>, %34, %cst_23 [2] : vector<1x1x128xf32> to vector<1x1xf32>
    %36 = vector.shape_cast %35 : vector<1x1xf32> to vector<1x1x1xf32>
    %37 = vector.extract_strided_slice %30 {offsets = [0, 0, 0], sizes = [1, 1, 128], strides = [1, 1, 1]} : vector<1x1x256xf32> to vector<1x1x128xf32>
    %cst_24 = arith.constant dense<0.000000e+00> : vector<1x1xf32>
    %38 = vector.multi_reduction <add>, %37, %cst_24 [2] : vector<1x1x128xf32> to vector<1x1xf32>
    %39 = vector.shape_cast %38 : vector<1x1xf32> to vector<1x1x1xf32>
    %40 = vector.extract_strided_slice %30 {offsets = [0, 0, 128], sizes = [1, 1, 128], strides = [1, 1, 1]} : vector<1x1x256xf32> to vector<1x1x128xf32>
    %cst_25 = arith.constant dense<0.000000e+00> : vector<1x1xf32>
    %41 = vector.multi_reduction <add>, %40, %cst_25 [2] : vector<1x1x128xf32> to vector<1x1xf32>
    %42 = vector.shape_cast %41 : vector<1x1xf32> to vector<1x1x1xf32>
    %cst_26 = arith.constant 2.048000e+03 : f32
    %43 = vector.broadcast %cst_26 : f32 to vector<1x1x1xf32>
    %44 = arith.divf %33, %43 : vector<1x1x1xf32>
    %cst_27 = arith.constant 2.048000e+03 : f32
    %45 = vector.broadcast %cst_27 : f32 to vector<1x1x1xf32>
    %46 = arith.divf %36, %45 : vector<1x1x1xf32>
    %cst_28 = arith.constant 2.048000e+03 : f32
    %47 = vector.broadcast %cst_28 : f32 to vector<1x1x1xf32>
    %48 = arith.divf %39, %47 : vector<1x1x1xf32>
    %49 = arith.mulf %44, %44 : vector<1x1x1xf32>
    %50 = arith.subf %48, %49 : vector<1x1x1xf32>
    %cst_29 = arith.constant 9.99999974E-6 : f32
    %51 = vector.broadcast %cst_29 : f32 to vector<1x1x1xf32>
    %52 = arith.addf %50, %51 : vector<1x1x1xf32>
    %53 = math.rsqrt %52 : vector<1x1x1xf32>
    %cst_30 = arith.constant 2.048000e+03 : f32
    %54 = vector.broadcast %cst_30 : f32 to vector<1x1x1xf32>
    %55 = arith.divf %42, %54 : vector<1x1x1xf32>
    %56 = arith.mulf %46, %46 : vector<1x1x1xf32>
    %57 = arith.subf %55, %56 : vector<1x1x1xf32>
    %cst_31 = arith.constant 9.99999974E-6 : f32
    %58 = vector.broadcast %cst_31 : f32 to vector<1x1x1xf32>
    %59 = arith.addf %57, %58 : vector<1x1x1xf32>
    %60 = math.rsqrt %59 : vector<1x1x1xf32>
    %61 = tpu.iota {dimensions = array<i32: 2>} : vector<1x1x256xi32>
    %c128_i32 = arith.constant 128 : i32
    %62 = vector.broadcast %c128_i32 : i32 to vector<1x1x256xi32>
    %63 = arith.cmpi slt, %61, %62 : vector<1x1x256xi32>
    %64 = vector.shape_cast %44 : vector<1x1x1xf32> to vector<1x1x1xf32>
    %65 = vector.broadcast %64 : vector<1x1x1xf32> to vector<1x1x256xf32>
    %66 = vector.shape_cast %46 : vector<1x1x1xf32> to vector<1x1x1xf32>
    %67 = vector.broadcast %66 : vector<1x1x1xf32> to vector<1x1x256xf32>
    %68 = arith.select %63, %65, %67 : vector<1x1x256xi1>, vector<1x1x256xf32>
    %69 = vector.shape_cast %53 : vector<1x1x1xf32> to vector<1x1x1xf32>
    %70 = vector.broadcast %69 : vector<1x1x1xf32> to vector<1x1x256xf32>
    %71 = vector.shape_cast %60 : vector<1x1x1xf32> to vector<1x1x1xf32>
    %72 = vector.broadcast %71 : vector<1x1x1xf32> to vector<1x1x256xf32>
    %73 = arith.select %63, %70, %72 : vector<1x1x256xi1>, vector<1x1x256xf32>
    %74 = vector.shape_cast %24 : vector<1x256xf32> to vector<1x1x256xf32>
    %75 = arith.mulf %73, %74 : vector<1x1x256xf32>
    %76 = vector.shape_cast %25 : vector<1x256xf32> to vector<1x1x256xf32>
    %77 = arith.mulf %68, %75 : vector<1x1x256xf32>
    %78 = arith.subf %76, %77 : vector<1x1x256xf32>
    %79 = vector.broadcast %75 : vector<1x1x256xf32> to vector<1x16x256xf32>
    %80 = arith.mulf %23, %79 : vector<1x16x256xf32>
    %81 = vector.broadcast %78 : vector<1x1x256xf32> to vector<1x16x256xf32>
    %82 = arith.addf %80, %81 : vector<1x16x256xf32>
    %cst_32 = arith.constant 0.000000e+00 : f32
    %83 = vector.broadcast %cst_32 : f32 to vector<1x16x256xf32>
    %84 = arith.cmpf ogt, %82, %83 : vector<1x16x256xf32>
    %cst_33 = arith.constant 2.000000e-01 : f32
    %85 = vector.broadcast %cst_33 : f32 to vector<1x16x256xf32>
    %86 = arith.mulf %85, %82 : vector<1x16x256xf32>
    %87 = arith.select %84, %82, %86 : vector<1x16x256xi1>, vector<1x16x256xf32>
    %88 = vector.shape_cast %87 : vector<1x16x256xf32> to vector<16x256xf32>
    %89 = arith.truncf %88 : vector<16x256xf32> to vector<16x256xbf16>
    %c0_34 = arith.constant 0 : index
    %c0_35 = arith.constant 0 : index
    %c0_36 = arith.constant 0 : index
    %90 = vector.load %arg2[%c0_34, %c0_35, %c0_36] : memref<1x16x256xf32, #tpu.memory_space<vmem>>, vector<1x16x256xf32>
    %91 = vector.shape_cast %90 : vector<1x16x256xf32> to vector<16x256xf32>
    %92 = arith.truncf %91 : vector<16x256xf32> to vector<16x256xbf16>
    %c3 = arith.constant 3 : index
    %c0_37 = arith.constant 0 : index
    %93 = vector.load %arg7[%c3, %c0_37] : memref<6x256xf32, #tpu.memory_space<vmem>>, vector<1x256xf32>
    %c0_38 = arith.constant 0 : index
    %c0_39 = arith.constant 0 : index
    %c0_40 = arith.constant 0 : index
    %94 = vector.load %arg4[%c0_38, %c0_39, %c0_40] : memref<6x16x16xbf16, #tpu.memory_space<vmem>>, vector<1x16x16xbf16>
    %95 = vector.shape_cast %94 : vector<1x16x16xbf16> to vector<16x16xbf16>
    %cst_41 = arith.constant dense<0.000000e+00> : vector<16x256xf32>
    %96 = tpu.matmul %95, %89, %cst_41 {dimension_numbers = #tpu.dot_dimension_numbers<[1], [0], [0], [1], [0, 0, 1, 1], [], []>} : vector<16x16xbf16>, vector<16x256xbf16>, vector<16x256xf32> -> vector<16x256xf32>
    %97 = arith.truncf %96 : vector<16x256xf32> to vector<16x256xbf16>
    %c3_42 = arith.constant 3 : index
    %c0_43 = arith.constant 0 : index
    %c0_44 = arith.constant 0 : index
    %98 = vector.load %arg4[%c3_42, %c0_43, %c0_44] : memref<6x16x16xbf16, #tpu.memory_space<vmem>>, vector<1x16x16xbf16>
    %99 = vector.shape_cast %98 : vector<1x16x16xbf16> to vector<16x16xbf16>
    %cst_45 = arith.constant dense<0.000000e+00> : vector<16x256xf32>
    %100 = tpu.matmul %99, %92, %cst_45 {dimension_numbers = #tpu.dot_dimension_numbers<[1], [0], [0], [1], [0, 0, 1, 1], [], []>} : vector<16x16xbf16>, vector<16x256xbf16>, vector<16x256xf32> -> vector<16x256xf32>
    %101 = arith.truncf %100 : vector<16x256xf32> to vector<16x256xbf16>
    %c0_46 = arith.constant 0 : index
    %c0_47 = arith.constant 0 : index
    %c0_48 = arith.constant 0 : index
    %102 = vector.load %arg5[%c0_46, %c0_47, %c0_48] : memref<6x256x256xbf16, #tpu.memory_space<vmem>>, vector<1x256x256xbf16>
    %103 = vector.shape_cast %102 : vector<1x256x256xbf16> to vector<256x256xbf16>
    %cst_49 = arith.constant dense<0.000000e+00> : vector<16x256xf32>
    %104 = tpu.matmul %97, %103, %cst_49 {dimension_numbers = #tpu.dot_dimension_numbers<[1], [0], [0], [1], [0, 0, 1, 1], [], []>} : vector<16x256xbf16>, vector<256x256xbf16>, vector<16x256xf32> -> vector<16x256xf32>
    %105 = vector.broadcast %93 : vector<1x256xf32> to vector<16x256xf32>
    %106 = arith.addf %105, %104 : vector<16x256xf32>
    %c3_50 = arith.constant 3 : index
    %c0_51 = arith.constant 0 : index
    %c0_52 = arith.constant 0 : index
    %107 = vector.load %arg5[%c3_50, %c0_51, %c0_52] : memref<6x256x256xbf16, #tpu.memory_space<vmem>>, vector<1x256x256xbf16>
    %108 = vector.shape_cast %107 : vector<1x256x256xbf16> to vector<256x256xbf16>
    %cst_53 = arith.constant dense<0.000000e+00> : vector<16x256xf32>
    %109 = tpu.matmul %101, %108, %cst_53 {dimension_numbers = #tpu.dot_dimension_numbers<[1], [0], [0], [1], [0, 0, 1, 1], [], []>} : vector<16x256xbf16>, vector<256x256xbf16>, vector<16x256xf32> -> vector<16x256xf32>
    %110 = arith.addf %106, %109 : vector<16x256xf32>
    %c1_54 = arith.constant 1 : index
    %c0_55 = arith.constant 0 : index
    %c0_56 = arith.constant 0 : index
    %111 = vector.load %arg4[%c1_54, %c0_55, %c0_56] : memref<6x16x16xbf16, #tpu.memory_space<vmem>>, vector<1x16x16xbf16>
    %112 = vector.shape_cast %111 : vector<1x16x16xbf16> to vector<16x16xbf16>
    %cst_57 = arith.constant dense<0.000000e+00> : vector<16x256xf32>
    %113 = tpu.matmul %112, %89, %cst_57 {dimension_numbers = #tpu.dot_dimension_numbers<[1], [0], [0], [1], [0, 0, 1, 1], [], []>} : vector<16x16xbf16>, vector<16x256xbf16>, vector<16x256xf32> -> vector<16x256xf32>
    %114 = arith.truncf %113 : vector<16x256xf32> to vector<16x256xbf16>
    %c4 = arith.constant 4 : index
    %c0_58 = arith.constant 0 : index
    %c0_59 = arith.constant 0 : index
    %115 = vector.load %arg4[%c4, %c0_58, %c0_59] : memref<6x16x16xbf16, #tpu.memory_space<vmem>>, vector<1x16x16xbf16>
    %116 = vector.shape_cast %115 : vector<1x16x16xbf16> to vector<16x16xbf16>
    %cst_60 = arith.constant dense<0.000000e+00> : vector<16x256xf32>
    %117 = tpu.matmul %116, %92, %cst_60 {dimension_numbers = #tpu.dot_dimension_numbers<[1], [0], [0], [1], [0, 0, 1, 1], [], []>} : vector<16x16xbf16>, vector<16x256xbf16>, vector<16x256xf32> -> vector<16x256xf32>
    %118 = arith.truncf %117 : vector<16x256xf32> to vector<16x256xbf16>
    %c1_61 = arith.constant 1 : index
    %c0_62 = arith.constant 0 : index
    %c0_63 = arith.constant 0 : index
    %119 = vector.load %arg5[%c1_61, %c0_62, %c0_63] : memref<6x256x256xbf16, #tpu.memory_space<vmem>>, vector<1x256x256xbf16>
    %120 = vector.shape_cast %119 : vector<1x256x256xbf16> to vector<256x256xbf16>
    %cst_64 = arith.constant dense<0.000000e+00> : vector<16x256xf32>
    %121 = tpu.matmul %114, %120, %cst_64 {dimension_numbers = #tpu.dot_dimension_numbers<[1], [0], [0], [1], [0, 0, 1, 1], [], []>} : vector<16x256xbf16>, vector<256x256xbf16>, vector<16x256xf32> -> vector<16x256xf32>
    %122 = arith.addf %110, %121 : vector<16x256xf32>
    %c4_65 = arith.constant 4 : index
    %c0_66 = arith.constant 0 : index
    %c0_67 = arith.constant 0 : index
    %123 = vector.load %arg5[%c4_65, %c0_66, %c0_67] : memref<6x256x256xbf16, #tpu.memory_space<vmem>>, vector<1x256x256xbf16>
    %124 = vector.shape_cast %123 : vector<1x256x256xbf16> to vector<256x256xbf16>
    %cst_68 = arith.constant dense<0.000000e+00> : vector<16x256xf32>
    %125 = tpu.matmul %118, %124, %cst_68 {dimension_numbers = #tpu.dot_dimension_numbers<[1], [0], [0], [1], [0, 0, 1, 1], [], []>} : vector<16x256xbf16>, vector<256x256xbf16>, vector<16x256xf32> -> vector<16x256xf32>
    %126 = arith.addf %122, %125 : vector<16x256xf32>
    %c2_69 = arith.constant 2 : index
    %c0_70 = arith.constant 0 : index
    %c0_71 = arith.constant 0 : index
    %127 = vector.load %arg4[%c2_69, %c0_70, %c0_71] : memref<6x16x16xbf16, #tpu.memory_space<vmem>>, vector<1x16x16xbf16>
    %128 = vector.shape_cast %127 : vector<1x16x16xbf16> to vector<16x16xbf16>
    %cst_72 = arith.constant dense<0.000000e+00> : vector<16x256xf32>
    %129 = tpu.matmul %128, %89, %cst_72 {dimension_numbers = #tpu.dot_dimension_numbers<[1], [0], [0], [1], [0, 0, 1, 1], [], []>} : vector<16x16xbf16>, vector<16x256xbf16>, vector<16x256xf32> -> vector<16x256xf32>
    %130 = arith.truncf %129 : vector<16x256xf32> to vector<16x256xbf16>
    %c5 = arith.constant 5 : index
    %c0_73 = arith.constant 0 : index
    %c0_74 = arith.constant 0 : index
    %131 = vector.load %arg4[%c5, %c0_73, %c0_74] : memref<6x16x16xbf16, #tpu.memory_space<vmem>>, vector<1x16x16xbf16>
    %132 = vector.shape_cast %131 : vector<1x16x16xbf16> to vector<16x16xbf16>
    %cst_75 = arith.constant dense<0.000000e+00> : vector<16x256xf32>
    %133 = tpu.matmul %132, %92, %cst_75 {dimension_numbers = #tpu.dot_dimension_numbers<[1], [0], [0], [1], [0, 0, 1, 1], [], []>} : vector<16x16xbf16>, vector<16x256xbf16>, vector<16x256xf32> -> vector<16x256xf32>
    %134 = arith.truncf %133 : vector<16x256xf32> to vector<16x256xbf16>
    %c2_76 = arith.constant 2 : index
    %c0_77 = arith.constant 0 : index
    %c0_78 = arith.constant 0 : index
    %135 = vector.load %arg5[%c2_76, %c0_77, %c0_78] : memref<6x256x256xbf16, #tpu.memory_space<vmem>>, vector<1x256x256xbf16>
    %136 = vector.shape_cast %135 : vector<1x256x256xbf16> to vector<256x256xbf16>
    %cst_79 = arith.constant dense<0.000000e+00> : vector<16x256xf32>
    %137 = tpu.matmul %130, %136, %cst_79 {dimension_numbers = #tpu.dot_dimension_numbers<[1], [0], [0], [1], [0, 0, 1, 1], [], []>} : vector<16x256xbf16>, vector<256x256xbf16>, vector<16x256xf32> -> vector<16x256xf32>
    %138 = arith.addf %126, %137 : vector<16x256xf32>
    %c5_80 = arith.constant 5 : index
    %c0_81 = arith.constant 0 : index
    %c0_82 = arith.constant 0 : index
    %139 = vector.load %arg5[%c5_80, %c0_81, %c0_82] : memref<6x256x256xbf16, #tpu.memory_space<vmem>>, vector<1x256x256xbf16>
    %140 = vector.shape_cast %139 : vector<1x256x256xbf16> to vector<256x256xbf16>
    %cst_83 = arith.constant dense<0.000000e+00> : vector<16x256xf32>
    %141 = tpu.matmul %134, %140, %cst_83 {dimension_numbers = #tpu.dot_dimension_numbers<[1], [0], [0], [1], [0, 0, 1, 1], [], []>} : vector<16x256xbf16>, vector<256x256xbf16>, vector<16x256xf32> -> vector<16x256xf32>
    %142 = arith.addf %138, %141 : vector<16x256xf32>
    %143 = vector.shape_cast %142 : vector<16x256xf32> to vector<1x16x256xf32>
    %c4_84 = arith.constant 4 : index
    %c0_85 = arith.constant 0 : index
    %144 = vector.load %arg7[%c4_84, %c0_85] : memref<6x256xf32, #tpu.memory_space<vmem>>, vector<1x256xf32>
    %c5_86 = arith.constant 5 : index
    %c0_87 = arith.constant 0 : index
    %145 = vector.load %arg7[%c5_86, %c0_87] : memref<6x256xf32, #tpu.memory_space<vmem>>, vector<1x256xf32>
    %cst_88 = arith.constant dense<0.000000e+00> : vector<1x256xf32>
    %146 = vector.multi_reduction <add>, %143, %cst_88 [1] : vector<1x16x256xf32> to vector<1x256xf32>
    %147 = vector.shape_cast %146 : vector<1x256xf32> to vector<1x1x256xf32>
    %148 = arith.mulf %143, %143 : vector<1x16x256xf32>
    %cst_89 = arith.constant dense<0.000000e+00> : vector<1x256xf32>
    %149 = vector.multi_reduction <add>, %148, %cst_89 [1] : vector<1x16x256xf32> to vector<1x256xf32>
    %150 = vector.shape_cast %149 : vector<1x256xf32> to vector<1x1x256xf32>
    %151 = vector.extract_strided_slice %147 {offsets = [0, 0, 0], sizes = [1, 1, 128], strides = [1, 1, 1]} : vector<1x1x256xf32> to vector<1x1x128xf32>
    %cst_90 = arith.constant dense<0.000000e+00> : vector<1x1xf32>
    %152 = vector.multi_reduction <add>, %151, %cst_90 [2] : vector<1x1x128xf32> to vector<1x1xf32>
    %153 = vector.shape_cast %152 : vector<1x1xf32> to vector<1x1x1xf32>
    %154 = vector.extract_strided_slice %147 {offsets = [0, 0, 128], sizes = [1, 1, 128], strides = [1, 1, 1]} : vector<1x1x256xf32> to vector<1x1x128xf32>
    %cst_91 = arith.constant dense<0.000000e+00> : vector<1x1xf32>
    %155 = vector.multi_reduction <add>, %154, %cst_91 [2] : vector<1x1x128xf32> to vector<1x1xf32>
    %156 = vector.shape_cast %155 : vector<1x1xf32> to vector<1x1x1xf32>
    %157 = vector.extract_strided_slice %150 {offsets = [0, 0, 0], sizes = [1, 1, 128], strides = [1, 1, 1]} : vector<1x1x256xf32> to vector<1x1x128xf32>
    %cst_92 = arith.constant dense<0.000000e+00> : vector<1x1xf32>
    %158 = vector.multi_reduction <add>, %157, %cst_92 [2] : vector<1x1x128xf32> to vector<1x1xf32>
    %159 = vector.shape_cast %158 : vector<1x1xf32> to vector<1x1x1xf32>
    %160 = vector.extract_strided_slice %150 {offsets = [0, 0, 128], sizes = [1, 1, 128], strides = [1, 1, 1]} : vector<1x1x256xf32> to vector<1x1x128xf32>
    %cst_93 = arith.constant dense<0.000000e+00> : vector<1x1xf32>
    %161 = vector.multi_reduction <add>, %160, %cst_93 [2] : vector<1x1x128xf32> to vector<1x1xf32>
    %162 = vector.shape_cast %161 : vector<1x1xf32> to vector<1x1x1xf32>
    %cst_94 = arith.constant 2.048000e+03 : f32
    %163 = vector.broadcast %cst_94 : f32 to vector<1x1x1xf32>
    %164 = arith.divf %153, %163 : vector<1x1x1xf32>
    %cst_95 = arith.constant 2.048000e+03 : f32
    %165 = vector.broadcast %cst_95 : f32 to vector<1x1x1xf32>
    %166 = arith.divf %156, %165 : vector<1x1x1xf32>
    %cst_96 = arith.constant 2.048000e+03 : f32
    %167 = vector.broadcast %cst_96 : f32 to vector<1x1x1xf32>
    %168 = arith.divf %159, %167 : vector<1x1x1xf32>
    %169 = arith.mulf %164, %164 : vector<1x1x1xf32>
    %170 = arith.subf %168, %169 : vector<1x1x1xf32>
    %cst_97 = arith.constant 9.99999974E-6 : f32
    %171 = vector.broadcast %cst_97 : f32 to vector<1x1x1xf32>
    %172 = arith.addf %170, %171 : vector<1x1x1xf32>
    %173 = math.rsqrt %172 : vector<1x1x1xf32>
    %cst_98 = arith.constant 2.048000e+03 : f32
    %174 = vector.broadcast %cst_98 : f32 to vector<1x1x1xf32>
    %175 = arith.divf %162, %174 : vector<1x1x1xf32>
    %176 = arith.mulf %166, %166 : vector<1x1x1xf32>
    %177 = arith.subf %175, %176 : vector<1x1x1xf32>
    %cst_99 = arith.constant 9.99999974E-6 : f32
    %178 = vector.broadcast %cst_99 : f32 to vector<1x1x1xf32>
    %179 = arith.addf %177, %178 : vector<1x1x1xf32>
    %180 = math.rsqrt %179 : vector<1x1x1xf32>
    %181 = tpu.iota {dimensions = array<i32: 2>} : vector<1x1x256xi32>
    %c128_i32_100 = arith.constant 128 : i32
    %182 = vector.broadcast %c128_i32_100 : i32 to vector<1x1x256xi32>
    %183 = arith.cmpi slt, %181, %182 : vector<1x1x256xi32>
    %184 = vector.shape_cast %164 : vector<1x1x1xf32> to vector<1x1x1xf32>
    %185 = vector.broadcast %184 : vector<1x1x1xf32> to vector<1x1x256xf32>
    %186 = vector.shape_cast %166 : vector<1x1x1xf32> to vector<1x1x1xf32>
    %187 = vector.broadcast %186 : vector<1x1x1xf32> to vector<1x1x256xf32>
    %188 = arith.select %183, %185, %187 : vector<1x1x256xi1>, vector<1x1x256xf32>
    %189 = vector.shape_cast %173 : vector<1x1x1xf32> to vector<1x1x1xf32>
    %190 = vector.broadcast %189 : vector<1x1x1xf32> to vector<1x1x256xf32>
    %191 = vector.shape_cast %180 : vector<1x1x1xf32> to vector<1x1x1xf32>
    %192 = vector.broadcast %191 : vector<1x1x1xf32> to vector<1x1x256xf32>
    %193 = arith.select %183, %190, %192 : vector<1x1x256xi1>, vector<1x1x256xf32>
    %194 = vector.shape_cast %144 : vector<1x256xf32> to vector<1x1x256xf32>
    %195 = arith.mulf %193, %194 : vector<1x1x256xf32>
    %196 = vector.shape_cast %145 : vector<1x256xf32> to vector<1x1x256xf32>
    %197 = arith.mulf %188, %195 : vector<1x1x256xf32>
    %198 = arith.subf %196, %197 : vector<1x1x256xf32>
    %199 = vector.broadcast %195 : vector<1x1x256xf32> to vector<1x16x256xf32>
    %200 = arith.mulf %143, %199 : vector<1x16x256xf32>
    %201 = vector.broadcast %198 : vector<1x1x256xf32> to vector<1x16x256xf32>
    %202 = arith.addf %200, %201 : vector<1x16x256xf32>
    %cst_101 = arith.constant 0.000000e+00 : f32
    %203 = vector.broadcast %cst_101 : f32 to vector<1x16x256xf32>
    %204 = arith.cmpf ogt, %202, %203 : vector<1x16x256xf32>
    %cst_102 = arith.constant 2.000000e-01 : f32
    %205 = vector.broadcast %cst_102 : f32 to vector<1x16x256xf32>
    %206 = arith.mulf %205, %202 : vector<1x16x256xf32>
    %207 = arith.select %204, %202, %206 : vector<1x16x256xi1>, vector<1x16x256xf32>
    %208 = vector.shape_cast %207 : vector<1x16x256xf32> to vector<16x256xf32>
    %209 = arith.truncf %208 : vector<16x256xf32> to vector<16x256xbf16>
    %c0_103 = arith.constant 0 : index
    %c0_104 = arith.constant 0 : index
    %210 = vector.load %arg6[%c0_103, %c0_104] : memref<256x128xbf16, #tpu.memory_space<vmem>>, vector<256x128xbf16>
    %cst_105 = arith.constant dense<0.000000e+00> : vector<16x128xf32>
    %211 = tpu.matmul %209, %210, %cst_105 {dimension_numbers = #tpu.dot_dimension_numbers<[1], [0], [0], [1], [0, 0, 1, 1], [], []>} : vector<16x256xbf16>, vector<256x128xbf16>, vector<16x128xf32> -> vector<16x128xf32>
    %c0_106 = arith.constant 0 : index
    %c0_107 = arith.constant 0 : index
    %212 = vector.load %arg8[%c0_106, %c0_107] : memref<1x128xf32, #tpu.memory_space<vmem>>, vector<1x128xf32>
    %213 = vector.broadcast %212 : vector<1x128xf32> to vector<16x128xf32>
    %214 = arith.addf %211, %213 : vector<16x128xf32>
    %215 = vector.shape_cast %214 : vector<16x128xf32> to vector<1x16x128xf32>
    %c0_108 = arith.constant 0 : index
    %c0_109 = arith.constant 0 : index
    %c0_110 = arith.constant 0 : index
    %216 = vector.load %arg9[%c0_108, %c0_109, %c0_110] : memref<1x16x128xf32, #tpu.memory_space<vmem>>, vector<1x16x128xf32>
    tpu.vector_store %arg9[%c0_108, %c0_109, %c0_110], %215 {strides = array<i32>} : memref<1x16x128xf32, #tpu.memory_space<vmem>>, vector<1x16x128xf32>,
    return
  }
  func.func @transform_0(%arg0: i32) -> (i32, i32, i32) {
    %c0_i32 = arith.constant 0 : i32
    %c0_i32_0 = arith.constant 0 : i32
    %c0_i32_1 = arith.constant 0 : i32
    return %arg0, %c0_i32, %c0_i32_0 : i32, i32, i32
  }
  func.func @transform_1(%arg0: i32) -> (i32, i32, i32) {
    %c0_i32 = arith.constant 0 : i32
    %c0_i32_0 = arith.constant 0 : i32
    %c0_i32_1 = arith.constant 0 : i32
    return %arg0, %c0_i32, %c0_i32_0 : i32, i32, i32
  }
  func.func @transform_2(%arg0: i32) -> (i32, i32, i32) {
    %c0_i32 = arith.constant 0 : i32
    %c0_i32_0 = arith.constant 0 : i32
    %c0_i32_1 = arith.constant 0 : i32
    %c0_i32_2 = arith.constant 0 : i32
    return %c0_i32, %c0_i32_0, %c0_i32_1 : i32, i32, i32
  }
  func.func @transform_3(%arg0: i32) -> (i32, i32, i32) {
    %c0_i32 = arith.constant 0 : i32
    %c0_i32_0 = arith.constant 0 : i32
    %c0_i32_1 = arith.constant 0 : i32
    %c0_i32_2 = arith.constant 0 : i32
    return %c0_i32, %c0_i32_0, %c0_i32_1 : i32, i32, i32
  }
  func.func @transform_4(%arg0: i32) -> (i32, i32, i32) {
    %c0_i32 = arith.constant 0 : i32
    %c0_i32_0 = arith.constant 0 : i32
    %c0_i32_1 = arith.constant 0 : i32
    %c0_i32_2 = arith.constant 0 : i32
    return %c0_i32, %c0_i32_0, %c0_i32_1 : i32, i32, i32
  }
  func.func @transform_5(%arg0: i32) -> (i32, i32) {
    %c0_i32 = arith.constant 0 : i32
    %c0_i32_0 = arith.constant 0 : i32
    %c0_i32_1 = arith.constant 0 : i32
    return %c0_i32, %c0_i32_0 : i32, i32
  }
  func.func @transform_6(%arg0: i32) -> (i32, i32) {
    %c0_i32 = arith.constant 0 : i32
    %c0_i32_0 = arith.constant 0 : i32
    %c0_i32_1 = arith.constant 0 : i32
    return %c0_i32, %c0_i32_0 : i32, i32
  }
  func.func @transform_7(%arg0: i32) -> (i32, i32) {
    %c0_i32 = arith.constant 0 : i32
    %c0_i32_0 = arith.constant 0 : i32
    %c0_i32_1 = arith.constant 0 : i32
    return %c0_i32, %c0_i32_0 : i32, i32
  }
  func.func @transform_8(%arg0: i32) -> (i32, i32, i32) {
    %c0_i32 = arith.constant 0 : i32
    %c0_i32_0 = arith.constant 0 : i32
    %c0_i32_1 = arith.constant 0 : i32
    return %arg0, %c0_i32, %c0_i32_0 : i32, i32, i32
  }
}

</mosaic_0001>

<bundles_post_ra>
// kernel: simvp_decoder_forward.1
= control target key start
LH: loop header
LB: loop body
LE: loop exit
PB: predicated region body
PF: predicated region fallthrough
CT: control target
= control target key end

     0   :  { %13 = vsyncpa [#allocation3], 0  ;;  %s4509_s27 = smov 0   ;;  %s5068_s0 = inlined_call_operand.vmem [shape: f32[2,9,128], index: 0, kind: input, shape index: {}]   ;;  %s5069_s1 = inlined_call_operand.vmem [shape: f32[2,16,256], index: 1, kind: input, shape index: {}]   ;;  %s5070_s2 = inlined_call_operand.vmem [shape: bf16[3,128,256], index: 2, kind: input, shape index: {}]   ;;  %s5071_s3 = inlined_call_operand.vmem [shape: bf16[6,16,16], index: 3, kind: input, shape index: {}]   ;;  %s5072_s4 = inlined_call_operand.hbm [shape: bf16[6,256,256], index: 4, kind: input, shape index: {}]   ;;  %s5073_s5 = inlined_call_operand.vmem [shape: bf16[256,128], index: 5, kind: input, shape index: {}]   ;;  %s5074_s6 = inlined_call_operand.vmem [shape: f32[6,256], index: 6, kind: input, shape index: {}]   ;;  %s5075_s7 = inlined_call_operand.vmem [shape: f32[1,128], index: 7, kind: input, shape index: {}]   ;;  %s5076_s8 = inlined_call_operand.vmem [shape: f32[2,16,128], index: 8, kind: output, shape index: {}]  }
   0x1 LB: > { %s245_s30 = sshll.u32 %s5072_s4, 4  ;;  %s4518_s9 = sadd.s32 4294967295, %s4458_s27   ;;  %s4458_s27 = sphi %s4509_s27, %s19_s27   ;;  %s246_s30 = int_to_ptr.hbm [resolvable:$true] %s245_s30 }
   0x2   : > { %p3000_p0 = scmp.ge.s32.totalorder %s4458_s27, 1  ;;  %p228_p1 = scmp.lt.s32.totalorder %s4458_s27, 3 }
   0x3   : > { %p4393_p2 = scmp.eq.s32.totalorder %s4518_s9, 0  ;;  %s4460_s10 = smov [#allocation2]  }
   0x4   : > { %p229_p3 = pnand %p3000_p0, %p228_p1  ;;  %s247_s11 = sshll.u32 %s4460_s10, 4  ;;  %s248_s11 = int_to_ptr.vmem [resolvable:$true] %s247_s11 }
   0x5   : > { %s4461_s12 = smov 128   ;;  %s4462_s13 = smov 8  }
   0x6   : > { %p4389_p4 = pneg %p229_p3  ;;  %288 = sbr.rel (%p229_p3) target bundleno = 1356 (0x54c), region = 52 }
   0x8   : > { %p4390_p5 = pnand %p4393_p2, %p4389_p4 }
   0xa   : > { %4392 = dma.hbm_to_vmem [thread:$0]  (!%p4390_p5), %s246_s30, 24576, %s248_s11, [#allocation3], %s4461_s12, %s4461_s12, %s4462_s13  }
   0xb   : > { %4453 = dma.done.wait (%p4393_p2), [#allocation3], 24576  }
   0xc   : > { %4455 = vsyncadd (%p4393_p2), [#allocation3], 4294942720  ;;  %v3069_v0 = vld [vmem:[%s5070_s2 + $0x70] sm:$0xf]  ;;  %v4138_v1 = vld [vmem:[%s5070_s2 + $0x74] sm:$0xf0] }
   0xd   : > { %v4137_v2 = vld [vmem:[%s5070_s2 + $0x74] sm:$0xf]  ;;  %v3070_v3 = vor.u32 %v4138_v1, %v3069_v0  ;;  %v3071_v4 = vld [vmem:[%s5070_s2 + $0x78] sm:$0xf0]  ;;  %v3061_v5 = vld [vmem:[%s5070_s2 + $0x60] sm:$0xf] }
   0xe   : > { %v4136_v6 = vld [vmem:[%s5070_s2 + $0x64] sm:$0xf0]  ;;  %v3074_v7 = vor.u32 %v4137_v2, %v3071_v4  ;;  %v4135_v8 = vld [vmem:[%s5070_s2 + $0x64] sm:$0xf]  ;;  %v3063_v9 = vld [vmem:[%s5070_s2 + $0x68] sm:$0xf0] }
   0xf   : > { %450 = vmatpush.bf16.msra.mxu0 %v3070_v3  ;;  %v3062_v10 = vor.u32 %v4136_v6, %v3061_v5  ;;  %v3066_v11 = vor.u32 %v4135_v8, %v3063_v9  ;;  %v3053_v12 = vld [vmem:[%s5070_s2 + $0x50] sm:$0xf]  ;;  %v4134_v13 = vld [vmem:[%s5070_s2 + $0x54] sm:$0xf0]  ;;  %v4133_v14 = vld [vmem:[%s5070_s2 + $0x54] sm:$0xf] }
  0x10   : > { %463 = vmatpush.bf16.msra.mxu1 %v3074_v7  ;;  %v3055_v15 = vld [vmem:[%s5070_s2 + $0x58] sm:$0xf0]  ;;  %v4169_v16 = vld [vmem:[%s5070_s2 + $0x174] sm:$0xf]  ;;  %v3054_v19 = vor.u32 %v4134_v13, %v3053_v12  ;;  %v4167_v20 = vld [vmem:[%s5070_s2 + $0x164] sm:$0xf] }
  0x11   : > { %v3167_v17 = vld [vmem:[%s5070_s2 + $0x178] sm:$0xf0]  ;;  %v3159_v21 = vld [vmem:[%s5070_s2 + $0x168] sm:$0xf0]  ;;  %v3058_v22 = vor.u32 %v4133_v14, %v3055_v15  ;;  %v3045_v23 = vld [vmem:[%s5070_s2 + $0x40] sm:$0xf] }
  0x12   : > { %v3170_v18 = vor.u32 %v4169_v16, %v3167_v17  ;;  %v4132_v24 = vld [vmem:[%s5070_s2 + $0x44] sm:$0xf0]  ;;  %v4131_v25 = vld [vmem:[%s5070_s2 + $0x44] sm:$0xf]  ;;  %v3162_v26 = vor.u32 %v4167_v20, %v3159_v21  ;;  %v3047_v27 = vld [vmem:[%s5070_s2 + $0x48] sm:$0xf0] }
  0x13   : > { %451 = vmatpush.bf16.msra.mxu0 %v3062_v10  ;;  %v3165_v28 = vld [vmem:[%s5070_s2 + $0x170] sm:$0xf]  ;;  %v4170_v29 = vld [vmem:[%s5070_s2 + $0x174] sm:$0xf0]  ;;  %v4165_v31 = vld [vmem:[%s5070_s2 + $0x154] sm:$0xf]  ;;  %v3046_v33 = vor.u32 %v4132_v24, %v3045_v23  ;;  %v3050_v36 = vor.u32 %v4131_v25, %v3047_v27 }
  0x14   : > { %464 = vmatpush.bf16.msra.mxu1 %v3066_v11  ;;  %603 = vmatpush.bf16.msra.mxu3 %v3170_v18  ;;  %v3166_v30 = vor.u32 %v4170_v29, %v3165_v28  ;;  %v3151_v32 = vld [vmem:[%s5070_s2 + $0x158] sm:$0xf0]  ;;  %v3037_v34 = vld [vmem:[%s5070_s2 + $0x30] sm:$0xf]  ;;  %v4130_v35 = vld [vmem:[%s5070_s2 + $0x34] sm:$0xf0] }
  0x15   : > { %v4129_v37 = vld [vmem:[%s5070_s2 + $0x34] sm:$0xf]  ;;  %v3154_v38 = vor.u32 %v4165_v31, %v3151_v32  ;;  %v3157_v39 = vld [vmem:[%s5070_s2 + $0x160] sm:$0xf]  ;;  %v4168_v40 = vld [vmem:[%s5070_s2 + $0x164] sm:$0xf0]  ;;  %v3038_v45 = vor.u32 %v4130_v35, %v3037_v34 }
  0x16   : > { %v3039_v41 = vld [vmem:[%s5070_s2 + $0x38] sm:$0xf0]  ;;  %590 = vmatpush.bf16.msra.mxu2 %v3166_v30  ;;  %v3158_v42 = vor.u32 %v4168_v40, %v3157_v39  ;;  %v4163_v43 = vld [vmem:[%s5070_s2 + $0x144] sm:$0xf]  ;;  %v3143_v44 = vld [vmem:[%s5070_s2 + $0x148] sm:$0xf0] }
  0x17   : > { %452 = vmatpush.bf16.msra.mxu0 %v3054_v19  ;;  %p328_p6 = scmp.lt.s32.totalorder %s4518_s9, 1  ;;  %v3029_v46 = vld [vmem:[%s5070_s2 + $0x20] sm:$0xf]  ;;  %v4128_v47 = vld [vmem:[%s5070_s2 + $0x24] sm:$0xf0]  ;;  %v3042_v48 = vor.u32 %v4129_v37, %v3039_v41  ;;  %v3146_v50 = vor.u32 %v4163_v43, %v3143_v44  ;;  %vm826_vm7 = vcmask 1040384  }
  0x18   : > { %465 = vmatpush.bf16.msra.mxu1 %v3058_v22  ;;  %604 = vmatpush.bf16.msra.mxu3 %v3162_v26  ;;  %v4127_v49 = vld [vmem:[%s5070_s2 + $0x24] sm:$0xf]  ;;  %v3149_v51 = vld [vmem:[%s5070_s2 + $0x150] sm:$0xf]  ;;  %v4166_v52 = vld [vmem:[%s5070_s2 + $0x154] sm:$0xf0]  ;;  %v3030_v58 = vor.u32 %v4128_v47, %v3029_v46 }
  0x19   : > { %v3031_v53 = vld [vmem:[%s5070_s2 + $0x28] sm:$0xf0]  ;;  %v3150_v54 = vor.u32 %v4166_v52, %v3149_v51  ;;  %v4161_v55 = vld [vmem:[%s5070_s2 + $0x134] sm:$0xf]  ;;  %v3135_v56 = vld [vmem:[%s5070_s2 + $0x138] sm:$0xf0] }
  0x1a   : > { %591 = vmatpush.bf16.msra.mxu2 %v3158_v42  ;;  %v3141_v57 = vld [vmem:[%s5070_s2 + $0x140] sm:$0xf]  ;;  %s5078_s9 = smov (!%p328_p6, %s4518_s9), 1  ;;  %v4164_v59 = vld [vmem:[%s5070_s2 + $0x144] sm:$0xf0]  ;;  %v3034_v60 = vor.u32 %v4127_v49, %v3031_v53  ;;  %v3138_v0 = vor.u32 %v4161_v55, %v3135_v56  ;;  %vm874_vm12 = vcmask 130048  }
  0x1b   : > { %453 = vmatpush.bf16.msra.mxu0 %v3046_v33  ;;  %v3021_v61 = vld [vmem:[%s5070_s2 + $0x10] sm:$0xf]  ;;  %v4126_v62 = vld [vmem:[%s5070_s2 + $0x14] sm:$0xf0]  ;;  %v4125_v63 = vld [vmem:[%s5070_s2 + $0x14] sm:$0xf]  ;;  %v3142_v2 = vor.u32 %v4164_v59, %v3141_v57 }
  0x1c   : > { %466 = vmatpush.bf16.msra.mxu1 %v3050_v36  ;;  %605 = vmatpush.bf16.msra.mxu3 %v3154_v38  ;;  %v3023_v1 = vld [vmem:[%s5070_s2 + $0x18] sm:$0xf0]  ;;  %v4159_v3 = vld [vmem:[%s5070_s2 + $0x124] sm:$0xf]  ;;  %v3127_v4 = vld [vmem:[%s5070_s2 + $0x128] sm:$0xf0]  ;;  %v3022_v7 = vor.u32 %v4126_v62, %v3021_v61 }
  0x1d   : > { %s4120_s10 = sshll.u32 %s5078_s9, 4  ;;  %v3133_v5 = vld [vmem:[%s5070_s2 + $0x130] sm:$0xf]  ;;  %v4162_v6 = vld [vmem:[%s5070_s2 + $0x134] sm:$0xf0]  ;;  %v3026_v9 = vor.u32 %v4125_v63, %v3023_v1  ;;  %v3130_v13 = vor.u32 %v4159_v3, %v3127_v4  ;;  %s4121_s20 = sshll.u32 %s5078_s9, 5 }
  0x1e   : > { %592 = vmatpush.bf16.msra.mxu2 %v3150_v54  ;;  %v3013_v8 = vld [vmem:[%s5070_s2] sm:$0xf]  ;;  %v4124_v10 = vld [vmem:[%s5070_s2 + $0x4] sm:$0xf0]  ;;  %v4123_v11 = vld [vmem:[%s5070_s2 + $0x4] sm:$0xf]  ;;  %s4706_s12 = scalar_lea.vmem %s5068_s0, %s4120_s10  ;;  %v3134_v17 = vor.u32 %v4162_v6, %v3133_v5  ;;  %s337_s25 = scalar_lea.vmem %s5069_s1, %s4121_s20 }
  0x1f   : > { %454 = vmatpush.bf16.msra.mxu0 %v3038_v45  ;;  %v3015_v12 = vld [vmem:[%s5070_s2 + $0x8] sm:$0xf0]  ;;  %v3229_v14 = vld [vmem:[%s5070_s2 + $0xf0] sm:$0xf]  ;;  %v4154_v15 = vld [vmem:[%s5070_s2 + $0xf4] sm:$0xf0]  ;;  %v3014_v21 = vor.u32 %v4124_v10, %v3013_v8  ;;  %s342_s23 = scalar_lea.vmem %s5076_s8, %s4120_s10 }
  0x20   : > { %467 = vmatpush.bf16.msra.mxu1 %v3042_v48  ;;  %606 = vmatpush.bf16.msra.mxu3 %v3146_v50  ;;  %v4153_v16 = vld [vmem:[%s5070_s2 + $0xf4] sm:$0xf]  ;;  %v3231_v18 = vld [vmem:[%s5070_s2 + $0xf8] sm:$0xf0]  ;;  %v3125_v22 = vld [vmem:[%s5070_s2 + $0x120] sm:$0xf]  ;;  %v3018_v24 = vor.u32 %v4123_v11, %v3015_v12  ;;  %v3230_v25 = vor.u32 %v4154_v15, %v3229_v14 }
  0x21   : > { %v4157_v19 = vld [vmem:[%s5070_s2 + $0x114] sm:$0xf]  ;;  %v3119_v20 = vld [vmem:[%s5070_s2 + $0x118] sm:$0xf0]  ;;  %v4160_v23 = vld [vmem:[%s5070_s2 + $0x124] sm:$0xf0]  ;;  %v3234_v27 = vor.u32 %v4153_v16, %v3231_v18 }
  0x22   : > { %593 = vmatpush.bf16.msra.mxu2 %v3142_v2  ;;  %v344_v26 = vld [vmem:[%s4706_s12] sm:$0xff]  ;;  %v4152_v29 = vld [vmem:[%s5070_s2 + $0xe4] sm:$0xf0]  ;;  %v3122_v31 = vor.u32 %v4157_v19, %v3119_v20  ;;  %v3223_v32 = vld [vmem:[%s5070_s2 + $0xe8] sm:$0xf0]  ;;  %v3126_v33 = vor.u32 %v4160_v23, %v3125_v22 }
  0x23   : > { %455 = vmatpush.bf16.msra.mxu0 %v3030_v58  ;;  %v3221_v28 = vld [vmem:[%s5070_s2 + $0xe0] sm:$0xf]  ;;  %v4151_v30 = vld [vmem:[%s5070_s2 + $0xe4] sm:$0xf]  ;;  %v3111_v35 = vld [vmem:[%s5070_s2 + $0x108] sm:$0xf0]  ;;  %v4742_v36 = vpack.c.bf16 %v344_v26, %v344_v26 }
  0x24   : > { %468 = vmatpush.bf16.msra.mxu1 %v3034_v60  ;;  %607 = vmatpush.bf16.msra.mxu3 %v3138_v0  ;;  %v4155_v34 = vld [vmem:[%s5070_s2 + $0x104] sm:$0xf]  ;;  %v3117_v37 = vld [vmem:[%s5070_s2 + $0x110] sm:$0xf]  ;;  %v4158_v38 = vld [vmem:[%s5070_s2 + $0x114] sm:$0xf0]  ;;  %v3222_v39 = vor.u32 %v4152_v29, %v3221_v28  ;;  %v3226_v40 = vor.u32 %v4151_v30, %v3223_v32 }
  0x25   : > { %v3213_v41 = vld [vmem:[%s5070_s2 + $0xd0] sm:$0xf]  ;;  %v4150_v42 = vld [vmem:[%s5070_s2 + $0xd4] sm:$0xf0]  ;;  %v3114_v43 = vor.u32 %v4155_v34, %v3111_v35  ;;  %v346_v44 = vld [vmem:[%s4706_s12 + $0x1] sm:$0xff]  ;;  %v3118_v47 = vor.u32 %v4158_v38, %v3117_v37 }
  0x26   : > { %594 = vmatpush.bf16.msra.mxu2 %v3134_v17  ;;  %v4149_v45 = vld [vmem:[%s5070_s2 + $0xd4] sm:$0xf]  ;;  %v3215_v46 = vld [vmem:[%s5070_s2 + $0xd8] sm:$0xf0]  ;;  %v3109_v48 = vld [vmem:[%s5070_s2 + $0x100] sm:$0xf]  ;;  %v3214_v50 = vor.u32 %v4150_v42, %v3213_v41  ;;  %v347_v51 = vpack.c.bf16 %v346_v44, %v346_v44 }
  0x27   : > { %456 = vmatpush.bf16.msra.mxu0 %v3022_v7  ;;  %v4156_v49 = vld [vmem:[%s5070_s2 + $0x104] sm:$0xf0]  ;;  %v3218_v52 = vor.u32 %v4149_v45, %v3215_v46  ;;  %v3205_v53 = vld [vmem:[%s5070_s2 + $0xc0] sm:$0xf]  ;;  %v4147_v55 = vld [vmem:[%s5070_s2 + $0xc4] sm:$0xf] }
  0x28   : > { %469 = vmatpush.bf16.msra.mxu1 %v3026_v9  ;;  %608 = vmatpush.bf16.msra.mxu3 %v3130_v13  ;;  %v4148_v54 = vld [vmem:[%s5070_s2 + $0xc4] sm:$0xf0]  ;;  %v3207_v56 = vld [vmem:[%s5070_s2 + $0xc8] sm:$0xf0]  ;;  %v3110_v57 = vor.u32 %v4156_v49, %v3109_v48  ;;  %v3197_v60 = vld [vmem:[%s5070_s2 + $0xb0] sm:$0xf] }
  0x29   : > { %v3206_v58 = vor.u32 %v4148_v54, %v3205_v53  ;;  %v3210_v59 = vor.u32 %v4147_v55, %v3207_v56  ;;  %v4146_v61 = vld [vmem:[%s5070_s2 + $0xb4] sm:$0xf0]  ;;  %v4145_v62 = vld [vmem:[%s5070_s2 + $0xb4] sm:$0xf]  ;;  %v3199_v63 = vld [vmem:[%s5070_s2 + $0xb8] sm:$0xf0] }
  0x2a   : > { %595 = vmatpush.bf16.msra.mxu2 %v3126_v33  ;;  %v3198_v0 = vor.u32 %v4146_v61, %v3197_v60  ;;  %v3202_v1 = vor.u32 %v4145_v62, %v3199_v63  ;;  %v3189_v2 = vld [vmem:[%s5070_s2 + $0xa0] sm:$0xf]  ;;  %v4144_v3 = vld [vmem:[%s5070_s2 + $0xa4] sm:$0xf0]  ;;  %v4143_v4 = vld [vmem:[%s5070_s2 + $0xa4] sm:$0xf] }
  0x2b   : > { %457 = vmatpush.bf16.msra.mxu0 %v3014_v21  ;;  %v3191_v5 = vld [vmem:[%s5070_s2 + $0xa8] sm:$0xf0]  ;;  %v3190_v6 = vor.u32 %v4144_v3, %v3189_v2  ;;  %v3181_v8 = vld [vmem:[%s5070_s2 + $0x90] sm:$0xf]  ;;  %v4142_v9 = vld [vmem:[%s5070_s2 + $0x94] sm:$0xf0] }
  0x2c   : > { %470 = vmatpush.bf16.msra.mxu1 %v3018_v24  ;;  %609 = vmatpush.bf16.msra.mxu3 %v3122_v31  ;;  %v3194_v7 = vor.u32 %v4143_v4, %v3191_v5  ;;  %v4141_v10 = vld [vmem:[%s5070_s2 + $0x94] sm:$0xf]  ;;  %v3183_v11 = vld [vmem:[%s5070_s2 + $0x98] sm:$0xf0]  ;;  %v3182_v12 = vor.u32 %v4142_v9, %v3181_v8  ;;  %v3173_v14 = vld [vmem:[%s5070_s2 + $0x80] sm:$0xf] }
  0x2d   : > { %v3186_v13 = vor.u32 %v4141_v10, %v3183_v11  ;;  %v4140_v15 = vld [vmem:[%s5070_s2 + $0x84] sm:$0xf0]  ;;  %v4139_v16 = vld [vmem:[%s5070_s2 + $0x84] sm:$0xf]  ;;  %v3175_v17 = vld [vmem:[%s5070_s2 + $0x88] sm:$0xf0] }
  0x2e   : > { %458 = vmatmul.bf16.vlgmr.msra.gmra.mxu0 %v4742_v36  ;;  %596 = vmatpush.bf16.msra.mxu2 %v3118_v47  ;;  %v3174_v18 = vor.u32 %v4140_v15, %v3173_v14  ;;  %v3178_v19 = vor.u32 %v4139_v16, %v3175_v17  ;;  %v4463_v9 = vmov 2048.0  }
  0x2f   : > { %696 = vmatpush.bf16.msrb.mxu0 %v3230_v25  ;;  %471 = vmatmul.bf16.vlgmr.msra.gmra.mxu1 %v4742_v36  ;;  %4408 = vrcp.f32 %v4463_v9  ;;  %v860_v9 = vld [vmem:[%s337_s25 + $0x8] sm:$0xff] }
  0x30   : > { %709 = vmatpush.bf16.msrb.mxu1 %v3234_v27  ;;  %610 = vmatpush.bf16.msra.mxu3 %v3114_v43  ;;  %v348_v27 = vld [vmem:[%s5074_s6] ss:$8 sm:$0x3] }
  0x31   : > { %v366_v29 = vperm.slane %v348_v27, 0  ;;  %v367_v30 = vperm.slane %v348_v27, 1 }
  0x32   : > { %597 = vmatpush.bf16.msra.mxu2 %v3110_v57 }
  0x33   : > { %697 = vmatpush.bf16.msrb.mxu0 %v3222_v39  ;;  %611 = vmatmul.bf16.vlgmr.msra.gmra.mxu3 %v347_v51 }
  0x34   : > { %710 = vmatpush.bf16.msrb.mxu1 %v3226_v40 }
  0x35   : > { %598 = vmatmul.bf16.vlgmr.msra.gmra.mxu2 %v347_v51  ;;  %v4409_v10 = vpop.eup %4408 }
  0x36   : > { %v769_v11 = vmul.f32 2048.0, %v4409_v10  ;;  %vm773_vm0 = vweird.f32 %v4409_v10 }
  0x37   : > { %698 = vmatpush.bf16.msrb.mxu0 %v3214_v50 }
  0x38   : > { %711 = vmatpush.bf16.msrb.mxu1 %v3218_v52 }
  0x3b   : > { %699 = vmatpush.bf16.msrb.mxu0 %v3206_v58 }
  0x3c   : > { %712 = vmatpush.bf16.msrb.mxu1 %v3210_v59 }
  0x3f   : > { %700 = vmatpush.bf16.msrb.mxu0 %v3198_v0 }
  0x40   : > { %713 = vmatpush.bf16.msrb.mxu1 %v3202_v1 }
  0x43   : > { %701 = vmatpush.bf16.msrb.mxu0 %v3190_v6 }
  0x44   : > { %714 = vmatpush.bf16.msrb.mxu1 %v3194_v7 }
  0x47   : > { %702 = vmatpush.bf16.msrb.mxu0 %v3182_v12  ;;  %v770_v12 = vsub.f32 1.0, %v769_v11  ;;  %v3310_v11 = vld [vmem:[#allocation2 + $0x70] sm:$0xf] }
  0x48   : > { %715 = vmatpush.bf16.msrb.mxu1 %v3186_v13 }
  0x49   : > { %v771_v13 = vmul.f32 %v4409_v10, %v770_v12 }
  0x4b   : > { %703 = vmatpush.bf16.msrb.mxu0 %v3174_v18  ;;  %v772_v14 = vadd.f32 %v4409_v10, %v771_v13  ;;  %v3374_v13 = vld [vmem:[#allocation2 + $0xf0] sm:$0xf] }
  0x4c   : > { %716 = vmatpush.bf16.msrb.mxu1 %v3178_v19 }
  0x4d   : > { %v4856_v15 = vsel %vm773_vm0, %v4409_v10, %v772_v14  ;;  %v862_v10 = vld [vmem:[%s337_s25 + $0x18] sm:$0xff] }
  0x4e   : > { %704 = vmatmul.bf16.vlgmr.msrb.gmra.mxu0 %v4742_v36 }
  0x4f   : > { %717 = vmatmul.bf16.vlgmr.msrb.gmra.mxu1 %v4742_v36 }
  0xab   : > { %v459_v20 = vpop.f32.mrf.mxu0 }
  0xac   : > { %v472_v21 = vpop.f32.mrf.mxu1  ;;  %v4836_v32 = vadd.f32 %v459_v20, %v366_v29 }
  0xad   : > { %v4838_v35 = vadd.f32 %v472_v21, %v367_v30 }
  0xae   : > { %v742_v39 = vmul.f32 %v4836_v32, %v4836_v32 }
  0xaf   : > { %v743_v42 = vmul.f32 %v4838_v35, %v4838_v35 }
  0xb3   : > { %v461_v22 = vpop.f32.mrf.mxu0 }
  0xb4   : > { %v474_v23 = vpop.f32.mrf.mxu1 }
  0xb6   : > { %v612_v24 = vpop.f32.mrf.mxu3 }
  0xb8   : > { %v599_v25 = vpop.f32.mrf.mxu2 }
  0xbe   : > { %v614_v26 = vpop.f32.mrf.mxu3 }
  0xc0   : > { %v601_v28 = vpop.f32.mrf.mxu2 }
  0xcb   : > { %v705_v31 = vpop.f32.mrf.mxu0 }
  0xcc   : > { %v706_v33 = vadd.f32 %v705_v31, %v599_v25  ;;  %v718_v34 = vpop.f32.mrf.mxu1 }
  0xcd   : > { %v719_v36 = vadd.f32 %v718_v34, %v612_v24 }
  0xce   : > { %v4840_v37 = vadd.f32 %v706_v33, %v366_v29 }
  0xcf   : > { %v4842_v38 = vadd.f32 %v719_v36, %v367_v30  ;;  %v3235_v36 = vld [vmem:[%s5074_s6 + $0x1] ss:$8 sm:$0x3] }
  0xd0   : > { %v728_v40 = vadd.f32 %v4840_v37, %v4836_v32  ;;  %v744_v41 = vmul.f32 %v4840_v37, %v4840_v37 }
  0xd1   : > { %v745_v43 = vmul.f32 %v4842_v38, %v4842_v38  ;;  %v735_v44 = vadd.f32 %v4842_v38, %v4838_v35 }
  0xd2   : > { %v729_v45 = vrot.slane %v728_v40, 4  ;;  %v746_v46 = vadd.f32 %v744_v41, %v742_v39 }
  0xd3   : > { %v707_v47 = vpop.f32.mrf.mxu0  ;;  %v736_v48 = vrot.slane %v735_v44, 4  ;;  %v753_v49 = vadd.f32 %v745_v43, %v743_v42  ;;  %v816_v43 = vperm.slane %v3235_v36, 1 }
  0xd4   : > { %v720_v50 = vpop.f32.mrf.mxu1  ;;  %v747_v51 = vrot.slane %v746_v46, 4  ;;  %v730_v54 = vadd.f32 %v729_v45, %v728_v40 }
  0xd5   : > { %v737_v52 = vadd.f32 %v736_v48, %v735_v44  ;;  %v754_v53 = vrot.slane %v753_v49, 4 }
  0xd6   : > { %v748_v57 = vadd.f32 %v747_v51, %v746_v46  ;;  %v731_v60 = vrot.slane %v730_v54, 2 }
  0xd7   : > { %v738_v55 = vrot.slane %v737_v52, 2  ;;  %v755_v56 = vadd.f32 %v754_v53, %v753_v49  ;;  %v815_v49 = vperm.slane %v3235_v36, 0  ;;  %v3366_v36 = vld [vmem:[#allocation2 + $0xe0] sm:$0xf] }
  0xd8   : > { %v749_v63 = vrot.slane %v748_v57, 2  ;;  %v732_v2 = vadd.f32 %v731_v60, %v730_v54 }
  0xd9   : > { %v739_v58 = vadd.f32 %v738_v55, %v737_v52  ;;  %v756_v59 = vrot.slane %v755_v56, 2 }
  0xda   : > { %v750_v4 = vadd.f32 %v749_v63, %v748_v57  ;;  %v733_v5 = vrot.slane %v732_v2, 1 }
  0xdb   : > { %v740_v61 = vrot.slane %v739_v58, 1  ;;  %v757_v62 = vadd.f32 %v756_v59, %v755_v56  ;;  %v3236_v56 = vld [vmem:[%s5074_s6 + $0x2] ss:$8 sm:$0x3] }
  0xdc   : > { %v751_v6 = vrot.slane %v750_v4, 1  ;;  %v734_v7 = vadd.f32 %v733_v5, %v732_v2 }
  0xdd   : > { %v741_v0 = vadd.f32 %v740_v61, %v739_v58  ;;  %v758_v1 = vrot.slane %v757_v62, 1 }
  0xde   : > { %v752_v8 = vadd.f32 %v751_v6, %v750_v4  ;;  %v861_v4 = vld [vmem:[%s337_s25 + $0x10] sm:$0xff] }
  0xdf   : > { %762 = vadd.xlane.f32.xlu0 %v741_v0  ;;  %v759_v3 = vadd.f32 %v758_v1, %v757_v62 }
  0xe1   : > { %766 = vadd.xlane.f32.xlu1 %v759_v3  ;;  %v859_v3 = vld [vmem:[%s337_s25] sm:$0xff] }
  0xe2   : > { %v4877_v12 = vpack.c.bf16 %v861_v4, %v859_v3  ;;  %v4181_v4 = vld [vmem:[#allocation2 + $0x44] sm:$0xf] }
  0xe7   : > { %760 = vadd.xlane.f32.xlu0 %v734_v7 }
  0xe9   : > { %764 = vadd.xlane.f32.xlu1 %v752_v8 }
 0x152   : > { %v763_v16 = vpop.xlane.xlu0 %762 }
 0x153   : > { %v776_v17 = vmul.f32 %v4856_v15, %v763_v16 }
 0x154   : > { %v767_v18 = vpop.xlane.xlu1 %766 }
 0x155   : > { %v792_v19 = vmul.f32 %v776_v17, %v776_v17  ;;  %v791_v20 = vmul.f32 %v4856_v15, %v767_v18 }
 0x157   : > { %v793_v21 = vsub.f32 %v791_v20, %v792_v19  ;;  %v4187_v19 = vld [vmem:[#allocation2 + $0x74] sm:$0xf]  ;;  %v3312_v20 = vld [vmem:[#allocation2 + $0x78] sm:$0xf0] }
 0x159   : > { %v794_v22 = vadd.f32 1e-05, %v793_v21  ;;  %v4203_v21 = vld [vmem:[#allocation2 + $0xf4] sm:$0xf] }
 0x15a   : > { %v761_v23 = vpop.xlane.xlu0 %760 }
 0x15b   : > { %4410 = vrsqrt.f32 %v794_v22  ;;  %v775_v24 = vmul.f32 %v4856_v15, %v761_v23  ;;  %vm801_vm2 = vweird.f32 %v794_v22 }
 0x15c   : > { %v765_v25 = vpop.xlane.xlu1 %764 }
 0x15d   : > { %v778_v26 = vmul.f32 %v775_v24, %v775_v24  ;;  %v777_v27 = vmul.f32 %v4856_v15, %v765_v25 }
 0x15f   : > { %v779_v28 = vsub.f32 %v777_v27, %v778_v26  ;;  %v4881_v27 = vpack.c.bf16 %v862_v10, %v860_v9  ;;  %v3342_v9 = vld [vmem:[#allocation2 + $0xb0] sm:$0xf]  ;;  %v4196_v10 = vld [vmem:[#allocation2 + $0xb4] sm:$0xf0] }
 0x161   : > { %v4411_v29 = vpop.eup %4410  ;;  %v780_v30 = vadd.f32 1e-05, %v779_v28  ;;  %v3376_v28 = vld [vmem:[#allocation2 + $0xf8] sm:$0xf0] }
 0x162   : > { %v796_v31 = vmul.f32 %v4411_v29, %v794_v22  ;;  %vm802_vm1 = vweird.f32 %v4411_v29 }
 0x163   : > { %4412 = vrsqrt.f32 %v780_v30  ;;  %vm803_vm3 = vmor %vm801_vm2, %vm802_vm1  ;;  %vm787_vm5 = vweird.f32 %v780_v30 }
 0x164   : > { %v797_v33 = vmul.f32 %v4411_v29, %v796_v31 }
 0x166   : > { %v798_v34 = vmul.f32 0.5, %v797_v33  ;;  %v4171_v33 = vld [vmem:[%s5071_s3] sm:$0xff] }
 0x168   : > { %v799_v39 = vsub.f32 1.5, %v798_v34 }
 0x169   : > { %v4413_v40 = vpop.eup %4412 }
 0x16a   : > { %v800_v41 = vmul.f32 %v4411_v29, %v799_v39  ;;  %v782_v42 = vmul.f32 %v4413_v40, %v780_v30  ;;  %vm788_vm4 = vweird.f32 %v4413_v40  ;;  %v4186_v30 = vld [vmem:[#allocation2 + $0x64] sm:$0xf0] }
 0x16b   : > { %vm789_vm6 = vmor %vm787_vm5, %vm788_vm4  ;;  %v4202_v39 = vld [vmem:[#allocation2 + $0xe4] sm:$0xf0] }
 0x16c   : > { %v804_v44 = vsel %vm803_vm3, %v4411_v29, %v800_v41  ;;  %v783_v45 = vmul.f32 %v4413_v40, %v782_v42  ;;  %v3302_v29 = vld [vmem:[#allocation2 + $0x60] sm:$0xf]  ;;  %v4185_v41 = vld [vmem:[#allocation2 + $0x64] sm:$0xf]  ;;  %v3304_v42 = vld [vmem:[#allocation2 + $0x68] sm:$0xf0] }
 0x16d   : > { %v820_v47 = vmul.f32 %v816_v43, %v804_v44  ;;  %v3303_v34 = vor.u32 %v4186_v30, %v3302_v29  ;;  %v3379_v43 = vor.u32 %v4203_v21, %v3376_v28  ;;  %v4201_v44 = vld [vmem:[#allocation2 + $0xe4] sm:$0xf]  ;;  %v4172_v21 = vld [vmem:[%s5071_s3 + $0x18] sm:$0xff]  ;;  %v3272_v30 = vld [vmem:[#allocation2 + $0x28] sm:$0xf0] }
 0x16e   : > { %v784_v46 = vmul.f32 0.5, %v783_v45  ;;  %v3367_v45 = vor.u32 %v4202_v39, %v3366_v36  ;;  %v4177_v29 = vld [vmem:[#allocation2 + $0x24] sm:$0xf]  ;;  %v3336_v36 = vld [vmem:[#allocation2 + $0xa8] sm:$0xf0] }
 0x16f   : > { %v822_v51 = vmul.f32 %v820_v47, %v776_v17  ;;  %v831_v57 = vperm.slane %v820_v47, 0  ;;  %v4184_v47 = vld [vmem:[#allocation2 + $0x54] sm:$0xf0]  ;;  %v3326_v39 = vld [vmem:[#allocation2 + $0x90] sm:$0xf] }
 0x170   : > { %v785_v48 = vsub.f32 1.5, %v784_v46  ;;  %v3294_v46 = vld [vmem:[#allocation2 + $0x50] sm:$0xf] }
 0x171   : > { %v825_v54 = vrot.slane %v822_v51, 7  ;;  %v833_v61 = vmul.f32 %v831_v57, %v4838_v35  ;;  %v835_v62 = vmul.f32 %v831_v57, %v4842_v38  ;;  %v4188_v35 = vld [vmem:[#allocation2 + $0x74] sm:$0xf0]  ;;  %v3295_v51 = vor.u32 %v4184_v47, %v3294_v46  ;;  %v3296_v57 = vld [vmem:[#allocation2 + $0x58] sm:$0xf0] }
 0x172   : > { %v786_v50 = vmul.f32 %v4413_v40, %v785_v48  ;;  %v4204_v38 = vld [vmem:[#allocation2 + $0xf4] sm:$0xf0]  ;;  %v3311_v22 = vor.u32 %v4188_v35, %v3310_v11  ;;  %v3368_v48 = vld [vmem:[#allocation2 + $0xe8] sm:$0xf0]  ;;  %v4174_v46 = vld [vmem:[#allocation2 + $0x4] sm:$0xf0] }
 0x173   : > { %v3375_v23 = vor.u32 %v4204_v38, %v3374_v13  ;;  %v3270_v13 = vld [vmem:[#allocation2 + $0x20] sm:$0xf]  ;;  %v4178_v38 = vld [vmem:[#allocation2 + $0x24] sm:$0xf0] }
 0x174   : > { %v790_v52 = vsel %vm789_vm6, %v4413_v40, %v786_v50  ;;  %1141 = vmatpush.bf16.msra.mxu0 %v3311_v22  ;;  %v3315_v40 = vor.u32 %v4187_v19, %v3312_v20  ;;  %v4200_v50 = vld [vmem:[#allocation2 + $0xd4] sm:$0xf0]  ;;  %v3334_v19 = vld [vmem:[#allocation2 + $0xa0] sm:$0xf]  ;;  %v4194_v20 = vld [vmem:[#allocation2 + $0xa4] sm:$0xf0]  ;;  %v3271_v22 = vor.u32 %v4178_v38, %v3270_v13 }
 0x175   : > { %v819_v53 = vmul.f32 %v815_v49, %v790_v52  ;;  %1155 = vmatpush.bf16.msra.mxu1 %v3375_v23  ;;  %v3358_v49 = vld [vmem:[#allocation2 + $0xd0] sm:$0xf]  ;;  %v3307_v52 = vor.u32 %v4185_v41, %v3304_v42  ;;  %v4175_v41 = vld [vmem:[#allocation2 + $0x14] sm:$0xf]  ;;  %v4233_v13 = vld [vmem:[#allocation2 + $0x3e4] sm:$0xf] }
 0x176   : > { %v3496_v38 = vld [vmem:[#allocation2 + $0x3e8] sm:$0xf0] }
 0x177   : > { %v821_v55 = vmul.f32 %v819_v53, %v775_v24  ;;  %v830_v58 = vperm.slane %v819_v53, 0  ;;  %v3286_v53 = vld [vmem:[#allocation2 + $0x40] sm:$0xf] }
 0x178   : > { %1142 = vmatpush.bf16.msra.mxu0 %v3303_v34  ;;  %v3335_v34 = vor.u32 %v4194_v20, %v3334_v19 }
 0x179   : > { %v827_v59 = vsel %vm826_vm7, %v821_v55, %v825_v54  ;;  %v832_v63 = vmul.f32 %v830_v58, %v4836_v32  ;;  %v834_v0 = vmul.f32 %v830_v58, %v4840_v37  ;;  %v4182_v54 = vld [vmem:[#allocation2 + $0x44] sm:$0xf0]  ;;  %v3371_v55 = vor.u32 %v4201_v44, %v3368_v48  ;;  %v4199_v58 = vld [vmem:[#allocation2 + $0xd4] sm:$0xf]  ;;  %1156 = vmatpush.bf16.msra.mxu1 %v3367_v45  ;;  %v3264_v44 = vld [vmem:[#allocation2 + $0x18] sm:$0xf0] }
 0x17a   : > { %v829_v60 = vsub.f32 %v3236_v56, %v827_v59  ;;  %v4183_v56 = vld [vmem:[#allocation2 + $0x54] sm:$0xf]  ;;  %v3359_v59 = vor.u32 %v4200_v50, %v3358_v49  ;;  %v3254_v45 = vld [vmem:[#allocation2] sm:$0xf]  ;;  %v3438_v50 = vld [vmem:[#allocation2 + $0x370] sm:$0xf] }
 0x17b   : > { %v4191_v48 = vld [vmem:[#allocation2 + $0x94] sm:$0xf] }
 0x17c   : > { %v837_v1 = vperm.slane %v829_v60, 0  ;;  %v838_v2 = vperm.slane %v829_v60, 1  ;;  %v3360_v60 = vld [vmem:[#allocation2 + $0xd8] sm:$0xf0]  ;;  %1143 = vmatpush.bf16.msra.mxu0 %v3295_v51  ;;  %v4220_v51 = vld [vmem:[#allocation2 + $0x374] sm:$0xf0] }
 0x17d   : > { %v3363_v3 = vor.u32 %v4199_v58, %v3360_v60  ;;  %1157 = vmatpush.bf16.msra.mxu1 %v3359_v59  ;;  %v3267_v58 = vor.u32 %v4175_v41, %v3264_v44  ;;  %v3439_v59 = vor.u32 %v4220_v51, %v3438_v50  ;;  %v4218_v41 = vld [vmem:[#allocation2 + $0x364] sm:$0xf0]  ;;  %v3464_v50 = vld [vmem:[#allocation2 + $0x3a8] sm:$0xf0]  ;;  %v3422_v51 = vld [vmem:[#allocation2 + $0x350] sm:$0xf] }
 0x17e   : > { %v841_v5 = vadd.f32 %v837_v1, %v832_v63  ;;  %v843_v6 = vadd.f32 %v837_v1, %v834_v0  ;;  %v842_v7 = vadd.f32 %v838_v2, %v833_v61  ;;  %v844_v8 = vadd.f32 %v838_v2, %v835_v62  ;;  %v3350_v61 = vld [vmem:[#allocation2 + $0xc0] sm:$0xf]  ;;  %v4198_v62 = vld [vmem:[#allocation2 + $0xc4] sm:$0xf0]  ;;  %v3278_v1 = vld [vmem:[#allocation2 + $0x30] sm:$0xf] }
 0x17f   : > { %v3287_v63 = vor.u32 %v4182_v54, %v3286_v53  ;;  %v3299_v0 = vor.u32 %v4183_v56, %v3296_v57  ;;  %v4180_v2 = vld [vmem:[#allocation2 + $0x34] sm:$0xf0]  ;;  %v3318_v53 = vld [vmem:[#allocation2 + $0x80] sm:$0xf]  ;;  %v4190_v54 = vld [vmem:[#allocation2 + $0x84] sm:$0xf0] }
 0x180   : > { %vm845_vm8 = vcmp.gt.f32.partialorder %v841_v5, 0.0  ;;  %vm847_vm9 = vcmp.gt.f32.partialorder %v843_v6, 0.0  ;;  %v849_v32 = vmul.f32 0.2, %v841_v5  ;;  %v851_v37 = vmul.f32 0.2, %v843_v6 }
 0x181   : > { %vm846_vm10 = vcmp.gt.f32.partialorder %v842_v7, 0.0  ;;  %vm848_vm11 = vcmp.gt.f32.partialorder %v844_v8, 0.0  ;;  %v850_v14 = vmul.f32 0.2, %v842_v7  ;;  %v852_v16 = vmul.f32 0.2, %v844_v8  ;;  %1144 = vmatpush.bf16.msra.mxu0 %v3287_v63 }
 0x182   : > { %v853_v17 = vsel %vm845_vm8, %v841_v5, %v849_v32  ;;  %v855_v18 = vsel %vm847_vm9, %v843_v6, %v851_v37  ;;  %v3288_v5 = vld [vmem:[#allocation2 + $0x48] sm:$0xf0]  ;;  %v4197_v6 = vld [vmem:[#allocation2 + $0xc4] sm:$0xf]  ;;  %v3279_v11 = vor.u32 %v4180_v2, %v3278_v1  ;;  %v4179_v37 = vld [vmem:[#allocation2 + $0x34] sm:$0xf] }
 0x183   : > { %v4879_v24 = vpack.c.bf16 %v855_v18, %v853_v17  ;;  %v854_v25 = vsel %vm846_vm10, %v842_v7, %v850_v14  ;;  %v856_v26 = vsel %vm848_vm11, %v844_v8, %v852_v16  ;;  %v3351_v7 = vor.u32 %v4198_v62, %v3350_v61  ;;  %v3352_v8 = vld [vmem:[#allocation2 + $0xc8] sm:$0xf0]  ;;  %v3280_v14 = vld [vmem:[#allocation2 + $0x38] sm:$0xf0]  ;;  %v4195_v16 = vld [vmem:[#allocation2 + $0xb4] sm:$0xf] }
 0x184   : > { %v4883_v31 = vpack.c.bf16 %v856_v26, %v854_v25  ;;  %v3291_v35 = vor.u32 %v4181_v4, %v3288_v5  ;;  %v3355_v32 = vor.u32 %v4197_v6, %v3352_v8  ;;  %v3343_v17 = vor.u32 %v4196_v10, %v3342_v9  ;;  %v3344_v18 = vld [vmem:[#allocation2 + $0xb8] sm:$0xf0]  ;;  %v3262_v25 = vld [vmem:[#allocation2 + $0x10] sm:$0xf]  ;;  %v4176_v26 = vld [vmem:[#allocation2 + $0x14] sm:$0xf0] }
 0x185   : > { %885 = vmatpush.bf16.msrb.mxu2 %v4879_v24  ;;  %1158 = vmatpush.bf16.msra.mxu1 %v3351_v7  ;;  %v3283_v23 = vor.u32 %v4179_v37, %v3280_v14  ;;  %v3347_v28 = vor.u32 %v4195_v16, %v3344_v18  ;;  %v3263_v42 = vor.u32 %v4176_v26, %v3262_v25  ;;  %v3502_v56 = vld [vmem:[#allocation2 + $0x3f0] sm:$0xf]  ;;  %v4236_v57 = vld [vmem:[#allocation2 + $0x3f4] sm:$0xf0]  ;;  %v4173_v61 = vld [vmem:[#allocation2 + $0x4] sm:$0xf] }
 0x186   : > { %899 = vmatpush.bf16.msrb.mxu3 %v4883_v31  ;;  %1145 = vmatpush.bf16.msra.mxu0 %v3279_v11  ;;  %v3256_v62 = vld [vmem:[#allocation2 + $0x8] sm:$0xf0]  ;;  %v4189_v63 = vld [vmem:[#allocation2 + $0x84] sm:$0xf]  ;;  %v4219_v2 = vld [vmem:[#allocation2 + $0x374] sm:$0xf]  ;;  %v3503_v4 = vor.u32 %v4236_v57, %v3502_v56  ;;  %v3499_v37 = vor.u32 %v4233_v13, %v3496_v38 }
 0x187   : > { %v3320_v1 = vld [vmem:[#allocation2 + $0x88] sm:$0xf0]  ;;  %v4235_v5 = vld [vmem:[#allocation2 + $0x3f4] sm:$0xf]  ;;  %v3504_v6 = vld [vmem:[#allocation2 + $0x3f8] sm:$0xf0]  ;;  %v3259_v7 = vor.u32 %v4173_v61, %v3256_v62 }
 0x188   : > { %3242 = vmatmul.msk.bf16.vlgmr.msrb.gmra.mxu2 %vm874_vm12, %v4171_v33  ;;  %v3323_v8 = vor.u32 %v4189_v63, %v3320_v1  ;;  %v3507_v10 = vor.u32 %v4235_v5, %v3504_v6  ;;  %v4217_v11 = vld [vmem:[#allocation2 + $0x364] sm:$0xf]  ;;  %v4215_v14 = vld [vmem:[#allocation2 + $0x354] sm:$0xf]  ;;  %v3424_v16 = vld [vmem:[#allocation2 + $0x358] sm:$0xf0] }
 0x189   : > { %926 = vmatpush.bf16.msra.mxu2 %v4877_v12  ;;  %3243 = vmatmul.msk.bf16.vlgmr.msrb.gmra.mxu3 %vm874_vm12, %v4171_v33  ;;  %v4193_v33 = vld [vmem:[#allocation2 + $0xa4] sm:$0xf]  ;;  %v3488_v18 = vld [vmem:[#allocation2 + $0x3d8] sm:$0xf0]  ;;  %v3427_v19 = vor.u32 %v4215_v14, %v3424_v16  ;;  %v3480_v25 = vld [vmem:[#allocation2 + $0x3c8] sm:$0xf0] }
 0x18a   : > { %940 = vmatpush.bf16.msra.mxu3 %v4881_v27  ;;  %1159 = vmatpush.bf16.msra.mxu1 %v3343_v17  ;;  %v3339_v47 = vor.u32 %v4193_v33, %v3336_v36  ;;  %v4231_v17 = vld [vmem:[#allocation2 + $0x3d4] sm:$0xf]  ;;  %v4234_v44 = vld [vmem:[#allocation2 + $0x3e4] sm:$0xf0]  ;;  %v4232_v56 = vld [vmem:[#allocation2 + $0x3d4] sm:$0xf0] }
 0x18b   : > { %1146 = vmatpush.bf16.msra.mxu0 %v3271_v22  ;;  %v3491_v20 = vor.u32 %v4231_v17, %v3488_v18  ;;  %v3416_v22 = vld [vmem:[#allocation2 + $0x348] sm:$0xf0]  ;;  %v4227_v33 = vld [vmem:[#allocation2 + $0x3b4] sm:$0xf]  ;;  %v3456_v61 = vld [vmem:[#allocation2 + $0x398] sm:$0xf0] }
 0x18c   : > { %v4207_v57 = vld [vmem:[#allocation2 + $0x314] sm:$0xf]  ;;  %v4214_v1 = vld [vmem:[#allocation2 + $0x344] sm:$0xf0]  ;;  %v4205_v6 = vld [vmem:[#allocation2 + $0x304] sm:$0xf] }
 0x18d   : > { %1169 = vmatpush.bf16.msrb.mxu2 %v3315_v40  ;;  %v4192_v40 = vld [vmem:[#allocation2 + $0x94] sm:$0xf0]  ;;  %v3470_v38 = vld [vmem:[#allocation2 + $0x3b0] sm:$0xf]  ;;  %v3398_v16 = vld [vmem:[#allocation2 + $0x320] sm:$0xf] }
 0x18e   : > { %1183 = vmatpush.bf16.msrb.mxu3 %v3379_v43  ;;  %v3275_v43 = vor.u32 %v4177_v29, %v3272_v30  ;;  %1160 = vmatpush.bf16.msra.mxu1 %v3335_v34  ;;  %v3327_v49 = vor.u32 %v4192_v40, %v3326_v39  ;;  %v4211_v29 = vld [vmem:[#allocation2 + $0x334] sm:$0xf]  ;;  %v3408_v30 = vld [vmem:[#allocation2 + $0x338] sm:$0xf0]  ;;  %v3430_v40 = vld [vmem:[#allocation2 + $0x360] sm:$0xf] }
 0x18f   : > { %1147 = vmatpush.bf16.msra.mxu0 %v3263_v42  ;;  %v3472_v34 = vld [vmem:[#allocation2 + $0x3b8] sm:$0xf0]  ;;  %v3411_v36 = vor.u32 %v4211_v29, %v3408_v30  ;;  %v3494_v42 = vld [vmem:[#allocation2 + $0x3e0] sm:$0xf]  ;;  %v4212_v13 = vld [vmem:[#allocation2 + $0x334] sm:$0xf0] }
 0x190   : > { %v3475_v39 = vor.u32 %v4227_v33, %v3472_v34  ;;  %v4210_v17 = vld [vmem:[#allocation2 + $0x324] sm:$0xf0]  ;;  %v3462_v18 = vld [vmem:[#allocation2 + $0x3a0] sm:$0xf] }
 0x191   : > { %1170 = vmatpush.bf16.msrb.mxu2 %v3307_v52  ;;  %v3328_v52 = vld [vmem:[#allocation2 + $0x98] sm:$0xf0]  ;;  %v3382_v30 = vld [vmem:[#allocation2 + $0x300] sm:$0xf]  ;;  %v4206_v33 = vld [vmem:[#allocation2 + $0x304] sm:$0xf0] }
 0x192   : > { %1184 = vmatpush.bf16.msrb.mxu3 %v3371_v55  ;;  %v3255_v55 = vor.u32 %v4174_v46, %v3254_v45  ;;  %v3331_v60 = vor.u32 %v4191_v48, %v3328_v52  ;;  %1161 = vmatpush.bf16.msra.mxu1 %v3327_v49  ;;  %v3495_v45 = vor.u32 %v4234_v44, %v3494_v42  ;;  %v4209_v46 = vld [vmem:[#allocation2 + $0x324] sm:$0xf]  ;;  %v4216_v52 = vld [vmem:[#allocation2 + $0x354] sm:$0xf0]  ;;  %v3446_v34 = vld [vmem:[#allocation2 + $0x380] sm:$0xf] }
 0x193   : > { %v4225_v48 = vld [vmem:[#allocation2 + $0x3a4] sm:$0xf] }
 0x194   : > { %1148 = vmatpush.bf16.msra.mxu0 %v3255_v55  ;;  %v3486_v55 = vld [vmem:[#allocation2 + $0x3d0] sm:$0xf] }
 0x195   : > { %1171 = vmatpush.bf16.msrb.mxu2 %v3299_v0  ;;  %v3319_v0 = vor.u32 %v4190_v54, %v3318_v53  ;;  %v3467_v53 = vor.u32 %v4225_v48, %v3464_v50  ;;  %v3423_v54 = vor.u32 %v4216_v52, %v3422_v51 }
 0x196   : > { %1185 = vmatpush.bf16.msrb.mxu3 %v3363_v3  ;;  %v3440_v3 = vld [vmem:[#allocation2 + $0x378] sm:$0xf0] }
 0x197   : > { %v3443_v9 = vor.u32 %v4219_v2, %v3440_v3  ;;  %1162 = vmatpush.bf16.msra.mxu1 %v3319_v0  ;;  %v3414_v0 = vld [vmem:[#allocation2 + $0x340] sm:$0xf] }
 0x198   : > { %3250 = vmatmul.msk.bf16.vlgmr.msra.gmra.mxu2 %vm874_vm12, %v4172_v21  ;;  %1399 = vmatpush.bf16.msrb.mxu0 %v3439_v59  ;;  %v3392_v59 = vld [vmem:[#allocation2 + $0x318] sm:$0xf0]  ;;  %v3478_v2 = vld [vmem:[#allocation2 + $0x3c0] sm:$0xf]  ;;  %v3415_v3 = vor.u32 %v4214_v1, %v3414_v0  ;;  %v3566_v1 = vld [vmem:[#allocation2 + $0x150] sm:$0xf] }
 0x199   : > { %1172 = vmatpush.bf16.msrb.mxu2 %v3291_v35  ;;  %3251 = vmatmul.msk.bf16.vlgmr.msra.gmra.mxu3 %vm874_vm12, %v4172_v21  ;;  %v3432_v35 = vld [vmem:[#allocation2 + $0x368] sm:$0xf0]  ;;  %v4213_v21 = vld [vmem:[#allocation2 + $0x344] sm:$0xf]  ;;  %v3395_v62 = vor.u32 %v4207_v57, %v3392_v59  ;;  %v4270_v57 = vld [vmem:[#allocation2 + $0x1f4] sm:$0xf0] }
 0x19a   : > { %1186 = vmatpush.bf16.msrb.mxu3 %v3355_v32  ;;  %v3435_v32 = vor.u32 %v4217_v11, %v3432_v35  ;;  %v3419_v26 = vor.u32 %v4213_v21, %v3416_v22  ;;  %v3406_v35 = vld [vmem:[#allocation2 + $0x330] sm:$0xf]  ;;  %v4252_v59 = vld [vmem:[#allocation2 + $0x164] sm:$0xf0] }
 0x19b   : > { %1413 = vmatpush.bf16.msrb.mxu1 %v3503_v4  ;;  %v4230_v4 = vld [vmem:[#allocation2 + $0x3c4] sm:$0xf0]  ;;  %v3390_v22 = vld [vmem:[#allocation2 + $0x310] sm:$0xf] }
 0x19c   : > { %v3479_v5 = vor.u32 %v4230_v4, %v3478_v2  ;;  %v4250_v2 = vld [vmem:[#allocation2 + $0x154] sm:$0xf0] }
 0x19d   : > { %1173 = vmatpush.bf16.msrb.mxu2 %v3283_v23  ;;  %v4229_v23 = vld [vmem:[#allocation2 + $0x3c4] sm:$0xf]  ;;  %v4266_v4 = vld [vmem:[#allocation2 + $0x1d4] sm:$0xf0] }
 0x19e   : > { %1187 = vmatpush.bf16.msrb.mxu3 %v3347_v28  ;;  %v3483_v28 = vor.u32 %v4229_v23, %v3480_v25  ;;  %v4208_v23 = vld [vmem:[#allocation2 + $0x314] sm:$0xf0]  ;;  %v3454_v25 = vld [vmem:[#allocation2 + $0x390] sm:$0xf] }
 0x19f   : > { %1414 = vmatpush.bf16.msrb.mxu1 %v3495_v45 }
 0x1a1   : > { %1174 = vmatpush.bf16.msrb.mxu2 %v3275_v43  ;;  %v3431_v43 = vor.u32 %v4218_v41, %v3430_v40 }
 0x1a2   : > { %1188 = vmatpush.bf16.msrb.mxu3 %v3339_v47  ;;  %v3400_v47 = vld [vmem:[#allocation2 + $0x328] sm:$0xf0] }
 0x1a3   : > { %1400 = vmatpush.bf16.msrb.mxu0 %v3431_v43  ;;  %v3403_v49 = vor.u32 %v4209_v46, %v3400_v47 }
 0x1a5   : > { %1175 = vmatpush.bf16.msrb.mxu2 %v3267_v58  ;;  %v3487_v58 = vor.u32 %v4232_v56, %v3486_v55  ;;  %v3646_v55 = vld [vmem:[#allocation2 + $0x1f0] sm:$0xf] }
 0x1a6   : > { %1189 = vmatpush.bf16.msrb.mxu3 %v3331_v60  ;;  %v4223_v60 = vld [vmem:[#allocation2 + $0x394] sm:$0xf] }
 0x1a7   : > { %v3459_v63 = vor.u32 %v4223_v60, %v3456_v61  ;;  %1401 = vmatpush.bf16.msrb.mxu0 %v3423_v54  ;;  %1415 = vmatpush.bf16.msrb.mxu1 %v3487_v58  ;;  %v4254_v54 = vld [vmem:[#allocation2 + $0x174] sm:$0xf0]  ;;  %v3574_v58 = vld [vmem:[#allocation2 + $0x160] sm:$0xf]  ;;  %v3647_v60 = vor.u32 %v4270_v57, %v3646_v55  ;;  %v3560_v57 = vld [vmem:[#allocation2 + $0x148] sm:$0xf0] }
 0x1a8   : > { %v3638_v61 = vld [vmem:[#allocation2 + $0x1e0] sm:$0xf] }
 0x1a9   : > { %1176 = vmatpush.bf16.msrb.mxu2 %v3259_v7  ;;  %v3384_v7 = vld [vmem:[#allocation2 + $0x308] sm:$0xf0] }
 0x1aa   : > { %1190 = vmatpush.bf16.msrb.mxu3 %v3323_v8  ;;  %v4221_v8 = vld [vmem:[#allocation2 + $0x384] sm:$0xf] }
 0x1ab   : > { %1402 = vmatpush.bf16.msrb.mxu0 %v3415_v3  ;;  %1416 = vmatpush.bf16.msrb.mxu1 %v3479_v5  ;;  %v3630_v3 = vld [vmem:[#allocation2 + $0x1d0] sm:$0xf]  ;;  %v3567_v5 = vor.u32 %v4250_v2, %v3566_v1  ;;  %v4256_v2 = vld [vmem:[#allocation2 + $0x184] sm:$0xf0] }
 0x1ad   : > { %1427 = vmatpush.bf16.msra.mxu2 %v3443_v9  ;;  %v3387_v9 = vor.u32 %v4205_v6, %v3384_v7  ;;  %v3631_v6 = vor.u32 %v4266_v4, %v3630_v3  ;;  %v4237_v7 = vld [vmem:[%s5071_s3 + $0x8] sm:$0xff]  ;;  %v3710_v3 = vld [vmem:[#allocation2 + $0x470] sm:$0xf]  ;;  %v4286_v4 = vld [vmem:[#allocation2 + $0x474] sm:$0xf0] }
 0x1ae   : > { %1441 = vmatpush.bf16.msra.mxu3 %v3507_v10  ;;  %v3448_v10 = vld [vmem:[#allocation2 + $0x388] sm:$0xf0] }
 0x1af   : > { %v3451_v11 = vor.u32 %v4221_v8, %v3448_v10  ;;  %v4238_v8 = vld [vmem:[%s5071_s3 + $0x20] sm:$0xff]  ;;  %v4248_v10 = vld [vmem:[#allocation2 + $0x144] sm:$0xf0] }
 0x1b1   : > { %1428 = vmatpush.bf16.msra.mxu2 %v3435_v32  ;;  %v3407_v32 = vor.u32 %v4212_v13, %v3406_v35  ;;  %v3622_v35 = vld [vmem:[#allocation2 + $0x1c0] sm:$0xf]  ;;  %v4264_v13 = vld [vmem:[#allocation2 + $0x1c4] sm:$0xf0] }
 0x1b2   : > { %1442 = vmatpush.bf16.msra.mxu3 %v3499_v37  ;;  %v4228_v37 = vld [vmem:[#allocation2 + $0x3b4] sm:$0xf0] }
 0x1b3   : > { %v3471_v14 = vor.u32 %v4228_v37, %v3470_v38  ;;  %1403 = vmatpush.bf16.msrb.mxu0 %v3407_v32  ;;  %v3623_v38 = vor.u32 %v4264_v13, %v3622_v35  ;;  %v4253_v32 = vld [vmem:[#allocation2 + $0x174] sm:$0xf]  ;;  %v3584_v37 = vld [vmem:[#allocation2 + $0x178] sm:$0xf0] }
 0x1b4   : > { %v4261_v35 = vld [vmem:[#allocation2 + $0x1b4] sm:$0xf]  ;;  %v3616_v13 = vld [vmem:[#allocation2 + $0x1b8] sm:$0xf0] }
 0x1b5   : > { %1429 = vmatpush.bf16.msra.mxu2 %v3427_v19  ;;  %1417 = vmatpush.bf16.msrb.mxu1 %v3471_v14  ;;  %v3399_v19 = vor.u32 %v4210_v17, %v3398_v16  ;;  %v4269_v14 = vld [vmem:[#allocation2 + $0x1f4] sm:$0xf]  ;;  %v3587_v16 = vor.u32 %v4253_v32, %v3584_v37  ;;  %v3648_v17 = vld [vmem:[#allocation2 + $0x1f8] sm:$0xf0]  ;;  %v3619_v32 = vor.u32 %v4261_v35, %v3616_v13  ;;  %v3702_v37 = vld [vmem:[#allocation2 + $0x460] sm:$0xf] }
 0x1b6   : > { %1443 = vmatpush.bf16.msra.mxu3 %v3491_v20  ;;  %v4226_v20 = vld [vmem:[#allocation2 + $0x3a4] sm:$0xf0]  ;;  %v3768_v13 = vld [vmem:[#allocation2 + $0x4e8] sm:$0xf0] }
 0x1b7   : > { %v3463_v21 = vor.u32 %v4226_v20, %v3462_v18  ;;  %1404 = vmatpush.bf16.msrb.mxu0 %v3399_v19  ;;  %v3651_v18 = vor.u32 %v4269_v14, %v3648_v17  ;;  %v3550_v19 = vld [vmem:[#allocation2 + $0x130] sm:$0xf]  ;;  %v4246_v20 = vld [vmem:[#allocation2 + $0x134] sm:$0xf0]  ;;  %v4284_v14 = vld [vmem:[#allocation2 + $0x464] sm:$0xf0] }
 0x1b8   : > { %v3703_v17 = vor.u32 %v4284_v14, %v3702_v37  ;;  %v3670_v37 = vld [vmem:[#allocation2 + $0x420] sm:$0xf]  ;;  %v4276_v14 = vld [vmem:[#allocation2 + $0x424] sm:$0xf0] }
 0x1b9   : > { %1430 = vmatpush.bf16.msra.mxu2 %v3419_v26  ;;  %v3391_v26 = vor.u32 %v4208_v23, %v3390_v22  ;;  %1418 = vmatpush.bf16.msrb.mxu1 %v3463_v21  ;;  %v3614_v21 = vld [vmem:[#allocation2 + $0x1b0] sm:$0xf]  ;;  %v3551_v22 = vor.u32 %v4246_v20, %v3550_v19  ;;  %v4262_v23 = vld [vmem:[#allocation2 + $0x1b4] sm:$0xf0]  ;;  %v4243_v19 = vld [vmem:[#allocation2 + $0x124] sm:$0xf] }
 0x1ba   : > { %1444 = vmatpush.bf16.msra.mxu3 %v3483_v28  ;;  %v4224_v28 = vld [vmem:[#allocation2 + $0x394] sm:$0xf0]  ;;  %v3544_v20 = vld [vmem:[#allocation2 + $0x128] sm:$0xf0] }
 0x1bb   : > { %v3455_v29 = vor.u32 %v4224_v28, %v3454_v25  ;;  %1405 = vmatpush.bf16.msrb.mxu0 %v3391_v26  ;;  %v3615_v25 = vor.u32 %v4262_v23, %v3614_v21  ;;  %v4251_v26 = vld [vmem:[#allocation2 + $0x164] sm:$0xf]  ;;  %v3576_v28 = vld [vmem:[#allocation2 + $0x168] sm:$0xf0] }
 0x1bc   : > { %v4259_v23 = vld [vmem:[#allocation2 + $0x1a4] sm:$0xf] }
 0x1bd   : > { %1431 = vmatpush.bf16.msra.mxu2 %v3411_v36  ;;  %1419 = vmatpush.bf16.msrb.mxu1 %v3455_v29  ;;  %v3383_v36 = vor.u32 %v4206_v33, %v3382_v30  ;;  %v3579_v29 = vor.u32 %v4251_v26, %v3576_v28  ;;  %v4267_v30 = vld [vmem:[#allocation2 + $0x1e4] sm:$0xf]  ;;  %v3640_v33 = vld [vmem:[#allocation2 + $0x1e8] sm:$0xf0]  ;;  %v3694_v28 = vld [vmem:[#allocation2 + $0x450] sm:$0xf] }
 0x1be   : > { %1445 = vmatpush.bf16.msra.mxu3 %v3475_v39  ;;  %v4222_v39 = vld [vmem:[#allocation2 + $0x384] sm:$0xf0] }
 0x1bf   : > { %v3447_v40 = vor.u32 %v4222_v39, %v3446_v34  ;;  %1406 = vmatpush.bf16.msrb.mxu0 %v3383_v36  ;;  %v3643_v34 = vor.u32 %v4267_v30, %v3640_v33  ;;  %v3542_v36 = vld [vmem:[#allocation2 + $0x120] sm:$0xf]  ;;  %v4244_v39 = vld [vmem:[#allocation2 + $0x124] sm:$0xf0]  ;;  %v3758_v30 = vld [vmem:[#allocation2 + $0x4d0] sm:$0xf] }
 0x1c1   : > { %1432 = vmatpush.bf16.msra.mxu2 %v3403_v49  ;;  %1420 = vmatpush.bf16.msrb.mxu1 %v3447_v40  ;;  %v3606_v40 = vld [vmem:[#allocation2 + $0x1a0] sm:$0xf] }
 0x1c2   : > { %1446 = vmatpush.bf16.msra.mxu3 %v3467_v53  ;;  %v3582_v53 = vld [vmem:[#allocation2 + $0x170] sm:$0xf] }
 0x1c3   : > { %v3583_v56 = vor.u32 %v4254_v54, %v3582_v53  ;;  %v4258_v54 = vld [vmem:[#allocation2 + $0x194] sm:$0xf0] }
 0x1c5   : > { %1433 = vmatpush.bf16.msra.mxu2 %v3395_v62  ;;  %v4268_v62 = vld [vmem:[#allocation2 + $0x1e4] sm:$0xf0] }
 0x1c6   : > { %1447 = vmatpush.bf16.msra.mxu3 %v3459_v63  ;;  %v3575_v63 = vor.u32 %v4252_v59, %v3574_v58  ;;  %v3639_v0 = vor.u32 %v4268_v62, %v3638_v61  ;;  %v4263_v58 = vld [vmem:[#allocation2 + $0x1c4] sm:$0xf]  ;;  %v3526_v62 = vld [vmem:[#allocation2 + $0x100] sm:$0xf] }
 0x1c9   : > { %1434 = vmatpush.bf16.msra.mxu2 %v3387_v9  ;;  %v3558_v9 = vld [vmem:[#allocation2 + $0x140] sm:$0xf] }
 0x1ca   : > { %1448 = vmatpush.bf16.msra.mxu3 %v3451_v11  ;;  %v3559_v11 = vor.u32 %v4248_v10, %v3558_v9  ;;  %v4245_v9 = vld [vmem:[#allocation2 + $0x134] sm:$0xf] }
 0x20b   : > { %v887_v41 = vpop.f32.mrf.mxu2 }
 0x20c   : > { %v901_v42 = vpop.f32.mrf.mxu3 }
 0x213   : > { %v889_v43 = vpop.f32.mrf.mxu2 }
 0x214   : > { %v906_v44 = vpack.c.bf16 %v889_v43, %v887_v41  ;;  %v903_v45 = vpop.f32.mrf.mxu3  ;;  %v3543_v41 = vor.u32 %v4244_v39, %v3542_v36  ;;  %v4241_v36 = vld [vmem:[#allocation2 + $0x114] sm:$0xf]  ;;  %v3536_v39 = vld [vmem:[#allocation2 + $0x118] sm:$0xf0] }
 0x215   : > { %v907_v46 = vpack.c.bf16 %v903_v45, %v901_v42  ;;  %v4260_v42 = vld [vmem:[#allocation2 + $0x1a4] sm:$0xf0]  ;;  %v3568_v45 = vld [vmem:[#allocation2 + $0x158] sm:$0xf0] }
 0x216   : > { %1149 = vmatmul.bf16.vlgmr.msra.gmra.mxu0 %v906_v44  ;;  %1177 = vmatmul.bf16.vlgmr.msrb.gmra.mxu2 %v906_v44  ;;  %v3607_v43 = vor.u32 %v4260_v42, %v3606_v40  ;;  %v4249_v44 = vld [vmem:[#allocation2 + $0x154] sm:$0xf] }
 0x217   : > { %1163 = vmatmul.bf16.vlgmr.msra.gmra.mxu1 %v907_v46  ;;  %1191 = vmatmul.bf16.vlgmr.msrb.gmra.mxu3 %v907_v46  ;;  %v4265_v46 = vld [vmem:[#allocation2 + $0x1d4] sm:$0xf] }
 0x218   : > { %1477 = vmatpush.bf16.msrb.mxu2 %v4879_v24  ;;  %1491 = vmatpush.bf16.msrb.mxu3 %v4883_v31  ;;  %v4257_v42 = vld [vmem:[#allocation2 + $0x194] sm:$0xf] }
 0x219   : > { %1734 = vmatpush.bf16.msra.mxu0 %v3583_v56  ;;  %1748 = vmatpush.bf16.msra.mxu1 %v3647_v60  ;;  %v4247_v56 = vld [vmem:[#allocation2 + $0x144] sm:$0xf]  ;;  %v3624_v60 = vld [vmem:[#allocation2 + $0x1c8] sm:$0xf0] }
 0x21a   : > { %v3563_v59 = vor.u32 %v4247_v56, %v3560_v57  ;;  %v3627_v61 = vor.u32 %v4263_v58, %v3624_v60  ;;  %v4255_v56 = vld [vmem:[#allocation2 + $0x184] sm:$0xf]  ;;  %v3592_v57 = vld [vmem:[#allocation2 + $0x188] sm:$0xf0]  ;;  %v4285_v58 = vld [vmem:[#allocation2 + $0x474] sm:$0xf] }
 0x21b   : > { %v928_v47 = vpop.f32.mrf.mxu2  ;;  %v3595_v60 = vor.u32 %v4255_v56, %v3592_v57 }
 0x21c   : > { %v942_v48 = vpop.f32.mrf.mxu3 }
 0x21d   : > { %1735 = vmatpush.bf16.msra.mxu0 %v3575_v63  ;;  %1749 = vmatpush.bf16.msra.mxu1 %v3639_v0  ;;  %v4240_v63 = vld [vmem:[#allocation2 + $0x104] sm:$0xf0]  ;;  %v3590_v0 = vld [vmem:[#allocation2 + $0x180] sm:$0xf] }
 0x21e   : > { %v3527_v1 = vor.u32 %v4240_v63, %v3526_v62  ;;  %v4301_v62 = vld [vmem:[#allocation2 + $0x4f4] sm:$0xf]  ;;  %v3776_v63 = vld [vmem:[#allocation2 + $0x4f8] sm:$0xf0] }
 0x221   : > { %1736 = vmatpush.bf16.msra.mxu0 %v3567_v5  ;;  %1750 = vmatpush.bf16.msra.mxu1 %v3631_v6  ;;  %v3591_v5 = vor.u32 %v4256_v2, %v3590_v0  ;;  %v3711_v6 = vor.u32 %v4286_v4, %v3710_v3  ;;  %v3678_v2 = vld [vmem:[#allocation2 + $0x430] sm:$0xf]  ;;  %v4278_v3 = vld [vmem:[#allocation2 + $0x434] sm:$0xf0] }
 0x222   : > { %v3742_v4 = vld [vmem:[#allocation2 + $0x4b0] sm:$0xf] }
 0x223   : > { %v930_v49 = vpop.f32.mrf.mxu2 }
 0x224   : > { %v947_v50 = vpack.c.bf16 %v930_v49, %v928_v47  ;;  %v944_v51 = vpop.f32.mrf.mxu3  ;;  %v3571_v47 = vor.u32 %v4249_v44, %v3568_v45  ;;  %v3686_v45 = vld [vmem:[#allocation2 + $0x440] sm:$0xf] }
 0x225   : > { %v948_v52 = vpack.c.bf16 %v944_v51, %v942_v48  ;;  %1737 = vmatpush.bf16.msra.mxu0 %v3559_v11  ;;  %1751 = vmatpush.bf16.msra.mxu1 %v3623_v38  ;;  %v3632_v48 = vld [vmem:[#allocation2 + $0x1d8] sm:$0xf0]  ;;  %v4242_v51 = vld [vmem:[#allocation2 + $0x114] sm:$0xf0] }
 0x226   : > { %1407 = vmatmul.bf16.vlgmr.msrb.gmra.mxu0 %v947_v50  ;;  %1435 = vmatmul.bf16.vlgmr.msra.gmra.mxu2 %v947_v50  ;;  %v3635_v49 = vor.u32 %v4265_v46, %v3632_v48  ;;  %v3534_v50 = vld [vmem:[#allocation2 + $0x110] sm:$0xf]  ;;  %v3552_v11 = vld [vmem:[#allocation2 + $0x138] sm:$0xf0]  ;;  %v4280_v46 = vld [vmem:[#allocation2 + $0x444] sm:$0xf0] }
 0x227   : > { %1421 = vmatmul.bf16.vlgmr.msrb.gmra.mxu1 %v948_v52  ;;  %1449 = vmatmul.bf16.vlgmr.msra.gmra.mxu3 %v948_v52  ;;  %v3598_v52 = vld [vmem:[#allocation2 + $0x190] sm:$0xf]  ;;  %v3535_v53 = vor.u32 %v4242_v51, %v3534_v50  ;;  %v3555_v38 = vor.u32 %v4245_v9, %v3552_v11  ;;  %v4296_v50 = vld [vmem:[#allocation2 + $0x4c4] sm:$0xf0]  ;;  %v4239_v51 = vld [vmem:[#allocation2 + $0x104] sm:$0xf] }
 0x228   : > { %1518 = vmatpush.bf16.msra.mxu2 %v4877_v12  ;;  %1532 = vmatpush.bf16.msra.mxu3 %v4881_v27  ;;  %v3599_v55 = vor.u32 %v4258_v54, %v3598_v52  ;;  %v3528_v52 = vld [vmem:[#allocation2 + $0x108] sm:$0xf0] }
 0x229   : > { %1738 = vmatpush.bf16.msra.mxu0 %v3551_v22  ;;  %1752 = vmatpush.bf16.msra.mxu1 %v3615_v25  ;;  %v3547_v22 = vor.u32 %v4243_v19, %v3544_v20  ;;  %v3608_v25 = vld [vmem:[#allocation2 + $0x1a8] sm:$0xf0]  ;;  %v3671_v19 = vor.u32 %v4276_v14, %v3670_v37  ;;  %v4292_v20 = vld [vmem:[#allocation2 + $0x4a4] sm:$0xf0]  ;;  %v4273_v37 = vld [vmem:[#allocation2 + $0x414] sm:$0xf] }
 0x22a   : > { %v3611_v26 = vor.u32 %v4259_v23, %v3608_v25  ;;  %v3704_v9 = vld [vmem:[#allocation2 + $0x468] sm:$0xf0]  ;;  %v3664_v14 = vld [vmem:[#allocation2 + $0x418] sm:$0xf0] }
 0x22d   : > { %1739 = vmatpush.bf16.msra.mxu0 %v3543_v41  ;;  %1753 = vmatpush.bf16.msra.mxu1 %v3607_v43  ;;  %v3539_v41 = vor.u32 %v4241_v36, %v3536_v39  ;;  %v3600_v43 = vld [vmem:[#allocation2 + $0x198] sm:$0xf0]  ;;  %v4274_v36 = vld [vmem:[#allocation2 + $0x414] sm:$0xf0]  ;;  %v3726_v39 = vld [vmem:[#allocation2 + $0x490] sm:$0xf] }
 0x22e   : > { %v3603_v44 = vor.u32 %v4257_v42, %v3600_v43 }
 0x231   : > { %1740 = vmatpush.bf16.msra.mxu0 %v3535_v53  ;;  %1754 = vmatpush.bf16.msra.mxu1 %v3599_v55  ;;  %v3531_v55 = vor.u32 %v4239_v51, %v3528_v52 }
 0x235   : > { %1741 = vmatpush.bf16.msra.mxu0 %v3527_v1  ;;  %1755 = vmatpush.bf16.msra.mxu1 %v3591_v5  ;;  %v3779_v1 = vor.u32 %v4301_v62, %v3776_v63  ;;  %v3679_v5 = vor.u32 %v4278_v3, %v3678_v2  ;;  %v4277_v63 = vld [vmem:[#allocation2 + $0x434] sm:$0xf] }
 0x236   : > { %3514 = vmatmul.msk.bf16.vlgmr.msrb.gmra.mxu2 %vm874_vm12, %v4237_v7 }
 0x237   : > { %3515 = vmatmul.msk.bf16.vlgmr.msrb.gmra.mxu3 %vm874_vm12, %v4237_v7  ;;  %1762 = vmatpush.bf16.msrb.mxu2 %v3587_v16  ;;  %v3774_v7 = vld [vmem:[#allocation2 + $0x4f0] sm:$0xf]  ;;  %v3766_v16 = vld [vmem:[#allocation2 + $0x4e0] sm:$0xf] }
 0x238   : > { %1776 = vmatpush.bf16.msrb.mxu3 %v3651_v18  ;;  %v4300_v18 = vld [vmem:[#allocation2 + $0x4e4] sm:$0xf0] }
 0x239   : > { %1987 = vmatpush.bf16.msrb.mxu0 %v3711_v6  ;;  %v3767_v21 = vor.u32 %v4300_v18, %v3766_v16  ;;  %v4294_v6 = vld [vmem:[#allocation2 + $0x4b4] sm:$0xf0]  ;;  %v3734_v16 = vld [vmem:[#allocation2 + $0x4a0] sm:$0xf] }
 0x23a   : > { %v3735_v25 = vor.u32 %v4292_v20, %v3734_v16  ;;  %v4289_v16 = vld [vmem:[#allocation2 + $0x494] sm:$0xf]  ;;  %v3728_v20 = vld [vmem:[#allocation2 + $0x498] sm:$0xf0] }
 0x23b   : > { %1763 = vmatpush.bf16.msrb.mxu2 %v3579_v29  ;;  %v4282_v29 = vld [vmem:[#allocation2 + $0x454] sm:$0xf0] }
 0x23c   : > { %1777 = vmatpush.bf16.msrb.mxu3 %v3643_v34  ;;  %v3695_v33 = vor.u32 %v4282_v29, %v3694_v28  ;;  %v4298_v34 = vld [vmem:[#allocation2 + $0x4d4] sm:$0xf0]  ;;  %v4297_v28 = vld [vmem:[#allocation2 + $0x4d4] sm:$0xf]  ;;  %v3760_v29 = vld [vmem:[#allocation2 + $0x4d8] sm:$0xf0] }
 0x23d   : > { %1988 = vmatpush.bf16.msrb.mxu0 %v3703_v17  ;;  %v3759_v40 = vor.u32 %v4298_v34, %v3758_v30  ;;  %v3662_v30 = vld [vmem:[#allocation2 + $0x410] sm:$0xf]  ;;  %v3763_v34 = vor.u32 %v4297_v28, %v3760_v29  ;;  %v4287_v28 = vld [vmem:[#allocation2 + $0x484] sm:$0xf] }
 0x23e   : > { %v3663_v42 = vor.u32 %v4274_v36, %v3662_v30 }
 0x23f   : > { %1764 = vmatpush.bf16.msrb.mxu2 %v3571_v47  ;;  %v3750_v47 = vld [vmem:[#allocation2 + $0x4c0] sm:$0xf] }
 0x240   : > { %1778 = vmatpush.bf16.msrb.mxu3 %v3635_v49  ;;  %v3687_v49 = vor.u32 %v4280_v46, %v3686_v45  ;;  %v3751_v54 = vor.u32 %v4296_v50, %v3750_v47  ;;  %v3688_v45 = vld [vmem:[#allocation2 + $0x448] sm:$0xf0]  ;;  %v4295_v46 = vld [vmem:[#allocation2 + $0x4c4] sm:$0xf] }
 0x241   : > { %1989 = vmatpush.bf16.msrb.mxu0 %v3695_v33  ;;  %v3752_v50 = vld [vmem:[#allocation2 + $0x4c8] sm:$0xf0] }
 0x242   : > { %v3755_v52 = vor.u32 %v4295_v46, %v3752_v50 }
 0x243   : > { %1765 = vmatpush.bf16.msrb.mxu2 %v3563_v59 }
 0x244   : > { %1779 = vmatpush.bf16.msrb.mxu3 %v3627_v61  ;;  %v3712_v61 = vld [vmem:[#allocation2 + $0x478] sm:$0xf0] }
 0x245   : > { %1990 = vmatpush.bf16.msrb.mxu0 %v3687_v49  ;;  %v3715_v0 = vor.u32 %v4285_v58, %v3712_v61 }
 0x246   : > { %3522 = vmatmul.msk.bf16.vlgmr.msra.gmra.mxu2 %vm874_vm12, %v4238_v8 }
 0x247   : > { %3523 = vmatmul.msk.bf16.vlgmr.msra.gmra.mxu3 %vm874_vm12, %v4238_v8  ;;  %v4302_v8 = vld [vmem:[#allocation2 + $0x4f4] sm:$0xf0]  ;;  %1766 = vmatpush.bf16.msrb.mxu2 %v3555_v38 }
 0x248   : > { %v3775_v10 = vor.u32 %v4302_v8, %v3774_v7  ;;  %1780 = vmatpush.bf16.msrb.mxu3 %v3619_v32  ;;  %v3743_v7 = vor.u32 %v4294_v6, %v3742_v4  ;;  %v4283_v8 = vld [vmem:[#allocation2 + $0x464] sm:$0xf] }
 0x249   : > { %1991 = vmatpush.bf16.msrb.mxu0 %v3679_v5  ;;  %v3707_v35 = vor.u32 %v4283_v8, %v3704_v9  ;;  %v3744_v5 = vld [vmem:[#allocation2 + $0x4b8] sm:$0xf0]  ;;  %v4275_v9 = vld [vmem:[#allocation2 + $0x424] sm:$0xf] }
 0x24a   : > { %2001 = vmatpush.bf16.msrb.mxu1 %v3775_v10  ;;  %v4299_v10 = vld [vmem:[#allocation2 + $0x4e4] sm:$0xf] }
 0x24b   : > { %1767 = vmatpush.bf16.msrb.mxu2 %v3547_v22  ;;  %v3771_v32 = vor.u32 %v4299_v10, %v3768_v13  ;;  %v3696_v22 = vld [vmem:[#allocation2 + $0x458] sm:$0xf0]  ;;  %v3672_v10 = vld [vmem:[#allocation2 + $0x428] sm:$0xf0] }
 0x24c   : > { %1781 = vmatpush.bf16.msrb.mxu3 %v3611_v26  ;;  %v3675_v13 = vor.u32 %v4275_v9, %v3672_v10  ;;  %v4317_v9 = vld [vmem:[#allocation2 + $0x264] sm:$0xf]  ;;  %v3848_v10 = vld [vmem:[#allocation2 + $0x268] sm:$0xf0] }
 0x24d   : > { %1992 = vmatpush.bf16.msrb.mxu0 %v3671_v19 }
 0x24e   : > { %2002 = vmatpush.bf16.msrb.mxu1 %v3767_v21  ;;  %v4281_v21 = vld [vmem:[#allocation2 + $0x454] sm:$0xf] }
 0x24f   : > { %1768 = vmatpush.bf16.msrb.mxu2 %v3539_v41  ;;  %v3699_v26 = vor.u32 %v4281_v21, %v3696_v22  ;;  %v4922_v41 = vld [vmem:[%s5074_s6 + $0x3] ss:$8 sm:$0x3]  ;;  %v3667_v21 = vor.u32 %v4273_v37, %v3664_v14  ;;  %v3731_v22 = vor.u32 %v4289_v16, %v3728_v20  ;;  %v4316_v37 = vld [vmem:[#allocation2 + $0x254] sm:$0xf0] }
 0x250   : > { %1782 = vmatpush.bf16.msrb.mxu3 %v3603_v44  ;;  %v4279_v44 = vld [vmem:[#allocation2 + $0x444] sm:$0xf]  ;;  %v1198_v47 = vperm.slane %v4922_v41, 0  ;;  %v3902_v14 = vld [vmem:[#allocation2 + $0x2d0] sm:$0xf] }
 0x251   : > { %1993 = vmatpush.bf16.msrb.mxu0 %v3663_v42  ;;  %v3691_v49 = vor.u32 %v4279_v44, %v3688_v45  ;;  %v3840_v20 = vld [vmem:[#allocation2 + $0x258] sm:$0xf0] }
 0x252   : > { %2003 = vmatpush.bf16.msrb.mxu1 %v3759_v40  ;;  %v4290_v40 = vld [vmem:[#allocation2 + $0x494] sm:$0xf0] }
 0x253   : > { %1769 = vmatpush.bf16.msrb.mxu2 %v3531_v55  ;;  %v3727_v43 = vor.u32 %v4290_v40, %v3726_v39  ;;  %v3718_v55 = vld [vmem:[#allocation2 + $0x480] sm:$0xf] }
 0x254   : > { %1783 = vmatpush.bf16.msrb.mxu3 %v3595_v60  ;;  %v4288_v60 = vld [vmem:[#allocation2 + $0x484] sm:$0xf0] }
 0x255   : > { %v3719_v62 = vor.u32 %v4288_v60, %v3718_v55  ;;  %v4336_v55 = vld [vmem:[#allocation2 + $0x2f4] sm:$0xf0]  ;;  %v3920_v60 = vld [vmem:[#allocation2 + $0x2f8] sm:$0xf0] }
 0x256   : > { %2004 = vmatpush.bf16.msrb.mxu1 %v3751_v54  ;;  %v4272_v54 = vld [vmem:[#allocation2 + $0x404] sm:$0xf0] }
 0x257   : > { %2015 = vmatpush.bf16.msra.mxu2 %v3715_v0  ;;  %v3680_v0 = vld [vmem:[#allocation2 + $0x438] sm:$0xf0] }
 0x258   : > { %2029 = vmatpush.bf16.msra.mxu3 %v3779_v1  ;;  %v4293_v1 = vld [vmem:[#allocation2 + $0x4b4] sm:$0xf]  ;;  %v3683_v4 = vor.u32 %v4277_v63, %v3680_v0 }
 0x259   : > { %v3747_v6 = vor.u32 %v4293_v1, %v3744_v5  ;;  %v3910_v5 = vld [vmem:[#allocation2 + $0x2e0] sm:$0xf] }
 0x25a   : > { %2005 = vmatpush.bf16.msrb.mxu1 %v3743_v7  ;;  %v1199_v7 = vperm.slane %v4922_v41, 1 }
 0x25b   : > { %2016 = vmatpush.bf16.msra.mxu2 %v3707_v35 }
 0x25c   : > { %2030 = vmatpush.bf16.msra.mxu3 %v3771_v32 }
 0x25e   : > { %2006 = vmatpush.bf16.msrb.mxu1 %v3735_v25  ;;  %v4271_v25 = vld [vmem:[#allocation2 + $0x404] sm:$0xf] }
 0x25f   : > { %2017 = vmatpush.bf16.msra.mxu2 %v3699_v26  ;;  %v3656_v26 = vld [vmem:[#allocation2 + $0x408] sm:$0xf0] }
 0x260   : > { %2031 = vmatpush.bf16.msra.mxu3 %v3763_v34  ;;  %v3659_v30 = vor.u32 %v4271_v25, %v3656_v26  ;;  %v3720_v34 = vld [vmem:[#allocation2 + $0x488] sm:$0xf0]  ;;  %v4331_v25 = vld [vmem:[#allocation2 + $0x2d4] sm:$0xf]  ;;  %v3904_v26 = vld [vmem:[#allocation2 + $0x2d8] sm:$0xf0] }
 0x261   : > { %v3723_v39 = vor.u32 %v4287_v28, %v3720_v34  ;;  %v3907_v28 = vor.u32 %v4331_v25, %v3904_v26  ;;  %v3894_v34 = vld [vmem:[#allocation2 + $0x2c0] sm:$0xf]  ;;  %v4322_v25 = vld [vmem:[#allocation2 + $0x284] sm:$0xf0]  ;;  %v4305_v26 = vld [vmem:[#allocation2 + $0x204] sm:$0xf] }
 0x262   : > { %2007 = vmatpush.bf16.msrb.mxu1 %v3727_v43 }
 0x263   : > { %2018 = vmatpush.bf16.msra.mxu2 %v3691_v49 }
 0x264   : > { %2032 = vmatpush.bf16.msra.mxu3 %v3755_v52  ;;  %v3854_v52 = vld [vmem:[#allocation2 + $0x270] sm:$0xf] }
 0x266   : > { %2008 = vmatpush.bf16.msrb.mxu1 %v3719_v62 }
 0x267   : > { %2019 = vmatpush.bf16.msra.mxu2 %v3683_v4  ;;  %v4318_v4 = vld [vmem:[#allocation2 + $0x264] sm:$0xf0] }
 0x268   : > { %2033 = vmatpush.bf16.msra.mxu3 %v3747_v6 }
 0x26b   : > { %2020 = vmatpush.bf16.msra.mxu2 %v3675_v13  ;;  %v4333_v13 = vld [vmem:[#allocation2 + $0x2e4] sm:$0xf] }
 0x26f   : > { %2021 = vmatpush.bf16.msra.mxu2 %v3667_v21 }
 0x273   : > { %2022 = vmatpush.bf16.msra.mxu2 %v3659_v30  ;;  %v4314_v30 = vld [vmem:[#allocation2 + $0x244] sm:$0xf0] }
 0x293   : > { %v1150_v48 = vpop.f32.mrf.mxu0 }
 0x294   : > { %v1164_v53 = vpop.f32.mrf.mxu1 }
 0x295   : > { %v4913_v59 = vadd.f32 %v1164_v53, %v1150_v48  ;;  %v3654_v53 = vld [vmem:[#allocation2 + $0x400] sm:$0xf] }
 0x296   : > { %v3655_v58 = vor.u32 %v4272_v54, %v3654_v53  ;;  %v4320_v53 = vld [vmem:[#allocation2 + $0x274] sm:$0xf0]  ;;  %v3918_v54 = vld [vmem:[#allocation2 + $0x2f0] sm:$0xf] }
 0x297   : > { %v1202_v2 = vadd.f32 %v1198_v47, %v4913_v59  ;;  %v3919_v0 = vor.u32 %v4336_v55, %v3918_v54  ;;  %v4311_v54 = vld [vmem:[#allocation2 + $0x234] sm:$0xf]  ;;  %v3824_v55 = vld [vmem:[#allocation2 + $0x238] sm:$0xf0] }
 0x298   : > { %1994 = vmatpush.bf16.msrb.mxu0 %v3655_v58  ;;  %v4335_v58 = vld [vmem:[#allocation2 + $0x2f4] sm:$0xf] }
 0x299   : > { %v1178_v11 = vpop.f32.mrf.mxu2 }
 0x29a   : > { %v1192_v38 = vpop.f32.mrf.mxu3 }
 0x29b   : > { %v4915_v17 = vadd.f32 %v1192_v38, %v1178_v11  ;;  %v1152_v18 = vpop.f32.mrf.mxu0  ;;  %v4291_v11 = vld [vmem:[#allocation2 + $0x4a4] sm:$0xf]  ;;  %v3736_v38 = vld [vmem:[#allocation2 + $0x4a8] sm:$0xf0] }
 0x29c   : > { %v1166_v23 = vpop.f32.mrf.mxu1  ;;  %v3739_v59 = vor.u32 %v4291_v11, %v3736_v38  ;;  %v3912_v38 = vld [vmem:[#allocation2 + $0x2e8] sm:$0xf0] }
 0x29d   : > { %v4917_v33 = vadd.f32 %v1166_v23, %v1152_v18  ;;  %v1203_v18 = vadd.f32 %v1199_v7, %v4915_v17 }
 0x29e   : > { %2034 = vmatpush.bf16.msra.mxu3 %v3739_v59  ;;  %v3838_v59 = vld [vmem:[#allocation2 + $0x250] sm:$0xf] }
 0x29f   : > { %v3839_v16 = vor.u32 %v4316_v37, %v3838_v59  ;;  %v4323_v37 = vld [vmem:[#allocation2 + $0x294] sm:$0xf] }
 0x2a1   : > { %v1180_v48 = vpop.f32.mrf.mxu2 }
 0x2a2   : > { %v1194_v51 = vpop.f32.mrf.mxu3  ;;  %2035 = vmatpush.bf16.msra.mxu3 %v3731_v22 }
 0x2a3   : > { %v1195_v56 = vadd.f32 %v1194_v51, %v1180_v48  ;;  %v1408_v57 = vpop.f32.mrf.mxu0 }
 0x2a4   : > { %v1422_v61 = vpop.f32.mrf.mxu1 }
 0x2a5   : > { %v1423_v3 = vadd.f32 %v1422_v61, %v1408_v57  ;;  %v1205_v40 = vadd.f32 %v1199_v7, %v1195_v56  ;;  %v4319_v56 = vld [vmem:[#allocation2 + $0x274] sm:$0xf]  ;;  %v3856_v57 = vld [vmem:[#allocation2 + $0x278] sm:$0xf0]  ;;  %v4334_v7 = vld [vmem:[#allocation2 + $0x2e4] sm:$0xf0] }
 0x2a6   : > { %2036 = vmatpush.bf16.msra.mxu3 %v3723_v39  ;;  %v3859_v1 = vor.u32 %v4319_v56, %v3856_v57  ;;  %v3911_v11 = vor.u32 %v4334_v7, %v3910_v5  ;;  %v4330_v39 = vld [vmem:[#allocation2 + $0x2c4] sm:$0xf0]  ;;  %v3827_v57 = vor.u32 %v4311_v54, %v3824_v55  ;;  %v4308_v7 = vld [vmem:[#allocation2 + $0x214] sm:$0xf0] }
 0x2a7   : > { %v4929_v8 = vadd.f32 %v1423_v3, %v1202_v2  ;;  %v4304_v2 = vld [vmem:[%s5071_s3 + $0x28] sm:$0xff]  ;;  %v3846_v3 = vld [vmem:[#allocation2 + $0x260] sm:$0xf] }
 0x2a8   : > { %v3847_v6 = vor.u32 %v4318_v4, %v3846_v3  ;;  %v4325_v3 = vld [vmem:[#allocation2 + $0x2a4] sm:$0xf]  ;;  %v3880_v4 = vld [vmem:[#allocation2 + $0x2a8] sm:$0xf0]  ;;  %v4350_v54 = vld [vmem:[#allocation2 + $0x564] sm:$0xf0] }
 0x2a9   : > { %v1436_v35 = vpop.f32.mrf.mxu2  ;;  %v3883_v5 = vor.u32 %v4325_v3, %v3880_v4  ;;  %v4348_v3 = vld [vmem:[#allocation2 + $0x554] sm:$0xf0]  ;;  %v4030_v4 = vld [vmem:[#allocation2 + $0x5d0] sm:$0xf] }
 0x2aa   : > { %v1450_v32 = vpop.f32.mrf.mxu3 }
 0x2ab   : > { %v1451_v19 = vadd.f32 %v1450_v32, %v1436_v35  ;;  %v3851_v35 = vor.u32 %v4317_v9, %v3848_v10  ;;  %v3915_v32 = vor.u32 %v4333_v13, %v3912_v38  ;;  %v3870_v9 = vld [vmem:[#allocation2 + $0x290] sm:$0xf]  ;;  %v3808_v13 = vld [vmem:[#allocation2 + $0x218] sm:$0xf0]  ;;  %v4950_v38 = vpop.f32.mrf.mxu0 }
 0x2ad   : > { %v4932_v23 = vadd.f32 %v1451_v19, %v1203_v18  ;;  %v4332_v18 = vld [vmem:[#allocation2 + $0x2d4] sm:$0xf0]  ;;  %v4315_v19 = vld [vmem:[#allocation2 + $0x254] sm:$0xf] }
 0x2ae   : > { %v3903_v21 = vor.u32 %v4332_v18, %v3902_v14  ;;  %v3843_v22 = vor.u32 %v4315_v19, %v3840_v20  ;;  %v3872_v14 = vld [vmem:[#allocation2 + $0x298] sm:$0xf0]  ;;  %v3798_v19 = vld [vmem:[#allocation2 + $0x200] sm:$0xf]  ;;  %v4306_v20 = vld [vmem:[#allocation2 + $0x204] sm:$0xf0] }
 0x2af   : > { %v3875_v18 = vor.u32 %v4323_v37, %v3872_v14 }
 0x2b1   : > { %v1438_v29 = vpop.f32.mrf.mxu2 }
 0x2b2   : > { %v1452_v36 = vpop.f32.mrf.mxu3 }
 0x2b3   : > { %v1453_v17 = vadd.f32 %v1452_v36, %v1438_v29  ;;  %v3830_v29 = vld [vmem:[#allocation2 + $0x240] sm:$0xf] }
 0x2b4   : > { %v3831_v36 = vor.u32 %v4314_v30, %v3830_v29 }
 0x2b5   : > { %v4934_v42 = vadd.f32 %v1453_v17, %v1205_v40  ;;  %v4313_v40 = vld [vmem:[#allocation2 + $0x244] sm:$0xf]  ;;  %v3832_v17 = vld [vmem:[#allocation2 + $0x248] sm:$0xf0] }
 0x2b9   : > { %v1479_v43 = vpop.f32.mrf.mxu2 }
 0x2ba   : > { %v1493_v44 = vpop.f32.mrf.mxu3 }
 0x2c1   : > { %v1481_v45 = vpop.f32.mrf.mxu2 }
 0x2c2   : > { %v1498_v46 = vpack.c.bf16 %v1481_v45, %v1479_v43  ;;  %v1495_v48 = vpop.f32.mrf.mxu3  ;;  %v3895_v43 = vor.u32 %v4330_v39, %v3894_v34  ;;  %v4329_v45 = vld [vmem:[#allocation2 + $0x2c4] sm:$0xf]  ;;  %v3982_v39 = vld [vmem:[#allocation2 + $0x570] sm:$0xf] }
 0x2c3   : > { %v1499_v49 = vpack.c.bf16 %v1495_v48, %v1493_v44  ;;  %v3835_v44 = vor.u32 %v4313_v40, %v3832_v17  ;;  %v4321_v34 = vld [vmem:[#allocation2 + $0x284] sm:$0xf]  ;;  %v4352_v17 = vld [vmem:[#allocation2 + $0x574] sm:$0xf0] }
 0x2c4   : > { %1742 = vmatmul.bf16.vlgmr.msra.gmra.mxu0 %v1498_v46  ;;  %1770 = vmatmul.bf16.vlgmr.msrb.gmra.mxu2 %v1498_v46  ;;  %v3896_v46 = vld [vmem:[#allocation2 + $0x2c8] sm:$0xf0] }
 0x2c5   : > { %1756 = vmatmul.bf16.vlgmr.msra.gmra.mxu1 %v1499_v49  ;;  %1784 = vmatmul.bf16.vlgmr.msrb.gmra.mxu3 %v1499_v49  ;;  %v3899_v48 = vor.u32 %v4329_v45, %v3896_v46  ;;  %v3822_v49 = vld [vmem:[#allocation2 + $0x230] sm:$0xf]  ;;  %v3983_v45 = vor.u32 %v4352_v17, %v3982_v39  ;;  %v4024_v39 = vld [vmem:[#allocation2 + $0x5c8] sm:$0xf0] }
 0x2c6   : > { %2065 = vmatpush.bf16.msra.mxu0 %v4879_v24  ;;  %2079 = vmatpush.bf16.msra.mxu1 %v4883_v31  ;;  %v3855_v24 = vor.u32 %v4320_v53, %v3854_v52  ;;  %v4328_v53 = vld [vmem:[#allocation2 + $0x2b4] sm:$0xf0] }
 0x2c7   : > { %2106 = vmatpush.bf16.msrb.mxu2 %v4877_v12  ;;  %2120 = vmatpush.bf16.msrb.mxu3 %v4881_v27  ;;  %v3923_v12 = vor.u32 %v4335_v58, %v3920_v60  ;;  %v4303_v27 = vld [vmem:[%s5071_s3 + $0x10] sm:$0xff]  ;;  %v3888_v60 = vld [vmem:[#allocation2 + $0x2b8] sm:$0xf0] }
 0x2c8   : > { %v4327_v58 = vld [vmem:[#allocation2 + $0x2b4] sm:$0xf] }
 0x2c9   : > { %v1520_v50 = vpop.f32.mrf.mxu2 }
 0x2ca   : > { %v1534_v51 = vpop.f32.mrf.mxu3 }
 0x2d1   : > { %v1522_v61 = vpop.f32.mrf.mxu2 }
 0x2d2   : > { %v1539_v62 = vpack.c.bf16 %v1522_v61, %v1520_v50  ;;  %v1536_v63 = vpop.f32.mrf.mxu3  ;;  %v4312_v50 = vld [vmem:[#allocation2 + $0x234] sm:$0xf0]  ;;  %v3891_v61 = vor.u32 %v4327_v58, %v3888_v60  ;;  %v4038_v58 = vld [vmem:[#allocation2 + $0x5e0] sm:$0xf]  ;;  %v4366_v60 = vld [vmem:[#allocation2 + $0x5e4] sm:$0xf0] }
 0x2d3   : > { %v1540_v31 = vpack.c.bf16 %v1536_v63, %v1534_v51  ;;  %v3886_v51 = vld [vmem:[#allocation2 + $0x2b0] sm:$0xf]  ;;  %v3823_v52 = vor.u32 %v4312_v50, %v3822_v49  ;;  %v4310_v63 = vld [vmem:[#allocation2 + $0x224] sm:$0xf0]  ;;  %v3984_v49 = vld [vmem:[#allocation2 + $0x578] sm:$0xf0] }
 0x2d4   : > { %1995 = vmatmul.bf16.vlgmr.msrb.gmra.mxu0 %v1539_v62  ;;  %2023 = vmatmul.bf16.vlgmr.msra.gmra.mxu2 %v1539_v62  ;;  %v3887_v56 = vor.u32 %v4328_v53, %v3886_v51  ;;  %v3814_v62 = vld [vmem:[#allocation2 + $0x220] sm:$0xf]  ;;  %v4367_v50 = vld [vmem:[#allocation2 + $0x5f4] sm:$0xf] }
 0x2d5   : > { %2009 = vmatmul.bf16.vlgmr.msrb.gmra.mxu1 %v1540_v31  ;;  %2037 = vmatmul.bf16.vlgmr.msra.gmra.mxu3 %v1540_v31  ;;  %v4326_v31 = vld [vmem:[#allocation2 + $0x2a4] sm:$0xf0]  ;;  %v3974_v53 = vld [vmem:[#allocation2 + $0x560] sm:$0xf] }
 0x2d6   : > { %2322 = vmatpush.bf16.msrb.mxu0 %v3855_v24  ;;  %2336 = vmatpush.bf16.msrb.mxu1 %v3919_v0  ;;  %v3878_v24 = vld [vmem:[#allocation2 + $0x2a0] sm:$0xf]  ;;  %v3815_v0 = vor.u32 %v4310_v63, %v3814_v62  ;;  %v4039_v63 = vor.u32 %v4366_v60, %v4038_v58  ;;  %v4358_v60 = vld [vmem:[#allocation2 + $0x5a4] sm:$0xf0] }
 0x2d7   : > { %2350 = vmatpush.bf16.msra.mxu2 %v3859_v1  ;;  %2364 = vmatpush.bf16.msra.mxu3 %v3923_v12  ;;  %v4309_v1 = vld [vmem:[#allocation2 + $0x224] sm:$0xf]  ;;  %v3816_v12 = vld [vmem:[#allocation2 + $0x228] sm:$0xf0]  ;;  %v4006_v58 = vld [vmem:[#allocation2 + $0x5a0] sm:$0xf] }
 0x2da   : > { %2323 = vmatpush.bf16.msrb.mxu0 %v3847_v6  ;;  %2337 = vmatpush.bf16.msrb.mxu1 %v3911_v11  ;;  %v3806_v6 = vld [vmem:[#allocation2 + $0x210] sm:$0xf]  ;;  %v4324_v11 = vld [vmem:[#allocation2 + $0x294] sm:$0xf0] }
 0x2db   : > { %2351 = vmatpush.bf16.msra.mxu2 %v3851_v35  ;;  %2365 = vmatpush.bf16.msra.mxu3 %v3915_v32  ;;  %v3807_v10 = vor.u32 %v4308_v7, %v3806_v6  ;;  %v4307_v35 = vld [vmem:[#allocation2 + $0x214] sm:$0xf]  ;;  %v3871_v32 = vor.u32 %v4324_v11, %v3870_v9  ;;  %v3968_v7 = vld [vmem:[#allocation2 + $0x558] sm:$0xf0] }
 0x2dc   : > { %v3811_v59 = vor.u32 %v4307_v35, %v3808_v13  ;;  %v4347_v6 = vld [vmem:[#allocation2 + $0x554] sm:$0xf]  ;;  %v4032_v13 = vld [vmem:[#allocation2 + $0x5d8] sm:$0xf0] }
 0x2dd   : > { %v4363_v35 = vld [vmem:[#allocation2 + $0x5d4] sm:$0xf] }
 0x2de   : > { %2324 = vmatpush.bf16.msrb.mxu0 %v3839_v16  ;;  %2338 = vmatpush.bf16.msrb.mxu1 %v3903_v21  ;;  %v4952_v16 = vpop.f32.mrf.mxu1  ;;  %v3862_v21 = vld [vmem:[#allocation2 + $0x280] sm:$0xf]  ;;  %v4035_v14 = vor.u32 %v4363_v35, %v4032_v13  ;;  %v4339_v13 = vld [vmem:[#allocation2 + $0x514] sm:$0xf] }
 0x2df   : > { %2352 = vmatpush.bf16.msra.mxu2 %v3843_v22  ;;  %2366 = vmatpush.bf16.msra.mxu3 %v3907_v28  ;;  %v3799_v22 = vor.u32 %v4306_v20, %v3798_v19  ;;  %v3800_v28 = vld [vmem:[#allocation2 + $0x208] sm:$0xf0]  ;;  %v3863_v29 = vor.u32 %v4322_v25, %v3862_v21  ;;  %v3958_v19 = vld [vmem:[#allocation2 + $0x540] sm:$0xf]  ;;  %v4346_v20 = vld [vmem:[#allocation2 + $0x544] sm:$0xf0] }
 0x2e0   : > { %v3803_v30 = vor.u32 %v4305_v26, %v3800_v28  ;;  %v4022_v21 = vld [vmem:[#allocation2 + $0x5c0] sm:$0xf]  ;;  %v3959_v26 = vor.u32 %v4346_v20, %v3958_v19  ;;  %v4362_v28 = vld [vmem:[#allocation2 + $0x5c4] sm:$0xf0] }
 0x2e1   : > { %v3926_v20 = vld [vmem:[#allocation2 + $0x500] sm:$0xf] }
 0x2e2   : > { %2325 = vmatpush.bf16.msrb.mxu0 %v3831_v36  ;;  %2339 = vmatpush.bf16.msrb.mxu1 %v3895_v43  ;;  %v3864_v36 = vld [vmem:[#allocation2 + $0x288] sm:$0xf0]  ;;  %v4046_v43 = vld [vmem:[#allocation2 + $0x5f0] sm:$0xf] }
 0x2e3   : > { %2353 = vmatpush.bf16.msra.mxu2 %v3835_v44  ;;  %2367 = vmatpush.bf16.msra.mxu3 %v3899_v48  ;;  %v3867_v40 = vor.u32 %v4321_v34, %v3864_v36  ;;  %v4368_v44 = vld [vmem:[#allocation2 + $0x5f4] sm:$0xf0]  ;;  %v4351_v48 = vld [vmem:[#allocation2 + $0x574] sm:$0xf]  ;;  %v4361_v36 = vld [vmem:[#allocation2 + $0x5c4] sm:$0xf] }
 0x2e4   : > { %3786 = vmatmul.msk.bf16.vlgmr.msra.gmra.mxu0 %vm874_vm12, %v4303_v27  ;;  %3794 = vmatmul.msk.bf16.vlgmr.msrb.gmra.mxu2 %vm874_vm12, %v4304_v2  ;;  %v4047_v46 = vor.u32 %v4368_v44, %v4046_v43  ;;  %v3987_v51 = vor.u32 %v4351_v48, %v3984_v49  ;;  %v4344_v43 = vld [vmem:[#allocation2 + $0x534] sm:$0xf0]  ;;  %v4014_v44 = vld [vmem:[#allocation2 + $0x5b0] sm:$0xf]  ;;  %v4343_v49 = vld [vmem:[#allocation2 + $0x534] sm:$0xf] }
 0x2e5   : > { %3787 = vmatmul.msk.bf16.vlgmr.msra.gmra.mxu1 %vm874_vm12, %v4303_v27  ;;  %3795 = vmatmul.msk.bf16.vlgmr.msrb.gmra.mxu3 %vm874_vm12, %v4304_v2  ;;  %v3879_v27 = vor.u32 %v4326_v31, %v3878_v24  ;;  %v3819_v2 = vor.u32 %v4309_v1, %v3816_v12  ;;  %v3976_v24 = vld [vmem:[#allocation2 + $0x568] sm:$0xf0]  ;;  %v4360_v48 = vld [vmem:[#allocation2 + $0x5b4] sm:$0xf0] }
 0x2e6   : > { %2326 = vmatpush.bf16.msrb.mxu0 %v3823_v52  ;;  %2340 = vmatpush.bf16.msrb.mxu1 %v3887_v56  ;;  %v4048_v52 = vld [vmem:[#allocation2 + $0x5f8] sm:$0xf0]  ;;  %v4040_v31 = vld [vmem:[#allocation2 + $0x5e8] sm:$0xf0] }
 0x2e7   : > { %2354 = vmatpush.bf16.msra.mxu2 %v3827_v57  ;;  %2368 = vmatpush.bf16.msra.mxu3 %v3891_v61  ;;  %v4051_v56 = vor.u32 %v4367_v50, %v4048_v52  ;;  %v3975_v57 = vor.u32 %v4350_v54, %v3974_v53  ;;  %v4349_v61 = vld [vmem:[#allocation2 + $0x564] sm:$0xf]  ;;  %v3952_v50 = vld [vmem:[#allocation2 + $0x538] sm:$0xf0]  ;;  %v4359_v53 = vld [vmem:[#allocation2 + $0x5b4] sm:$0xf] }
 0x2e8   : > { %v3979_v12 = vor.u32 %v4349_v61, %v3976_v24  ;;  %v3955_v52 = vor.u32 %v4343_v49, %v3952_v50  ;;  %v3942_v54 = vld [vmem:[#allocation2 + $0x520] sm:$0xf]  ;;  %v4357_v24 = vld [vmem:[#allocation2 + $0x5a4] sm:$0xf] }
 0x2ea   : > { %2327 = vmatpush.bf16.msrb.mxu0 %v3815_v0  ;;  %2341 = vmatpush.bf16.msrb.mxu1 %v3879_v27  ;;  %v4365_v0 = vld [vmem:[#allocation2 + $0x5e4] sm:$0xf] }
 0x2eb   : > { %2355 = vmatpush.bf16.msra.mxu2 %v3819_v2  ;;  %2369 = vmatpush.bf16.msra.mxu3 %v3883_v5  ;;  %v4043_v27 = vor.u32 %v4365_v0, %v4040_v31  ;;  %v3966_v2 = vld [vmem:[#allocation2 + $0x550] sm:$0xf]  ;;  %v4364_v5 = vld [vmem:[#allocation2 + $0x5d4] sm:$0xf0] }
 0x2ec   : > { %v4031_v11 = vor.u32 %v4364_v5, %v4030_v4  ;;  %v4340_v5 = vld [vmem:[#allocation2 + $0x514] sm:$0xf0] }
 0x2ee   : > { %2328 = vmatpush.bf16.msrb.mxu0 %v3807_v10  ;;  %2342 = vmatpush.bf16.msrb.mxu1 %v3871_v32  ;;  %v3967_v10 = vor.u32 %v4348_v3, %v3966_v2  ;;  %v3971_v32 = vor.u32 %v4347_v6, %v3968_v7  ;;  %v3934_v2 = vld [vmem:[#allocation2 + $0x510] sm:$0xf]  ;;  %v4356_v7 = vld [vmem:[#allocation2 + $0x594] sm:$0xf0] }
 0x2ef   : > { %2356 = vmatpush.bf16.msra.mxu2 %v3811_v59  ;;  %2370 = vmatpush.bf16.msra.mxu3 %v3875_v18  ;;  %v1425_v59 = vadd.f32 %v4952_v16, %v4950_v38  ;;  %v4023_v16 = vor.u32 %v4362_v28, %v4022_v21  ;;  %v3998_v6 = vld [vmem:[#allocation2 + $0x590] sm:$0xf]  ;;  %v4337_v28 = vld [vmem:[#allocation2 + $0x504] sm:$0xf] }
 0x2f0   : > { %v3999_v19 = vor.u32 %v4356_v7, %v3998_v6 }
 0x2f2   : > { %2329 = vmatpush.bf16.msrb.mxu0 %v3799_v22  ;;  %2343 = vmatpush.bf16.msrb.mxu1 %v3863_v29  ;;  %v4345_v29 = vld [vmem:[#allocation2 + $0x544] sm:$0xf] }
 0x2f3   : > { %2357 = vmatpush.bf16.msra.mxu2 %v3803_v30  ;;  %2371 = vmatpush.bf16.msra.mxu3 %v3867_v40  ;;  %v3960_v30 = vld [vmem:[#allocation2 + $0x548] sm:$0xf0] }
 0x2f4   : > { %v3963_v34 = vor.u32 %v4345_v29, %v3960_v30  ;;  %v3928_v29 = vld [vmem:[#allocation2 + $0x508] sm:$0xf0] }
 0x2f6   : > { %2575 = vmatpush.bf16.msra.mxu0 %v3983_v45  ;;  %2589 = vmatpush.bf16.msra.mxu1 %v4047_v46 }
 0x2f7   : > { %2603 = vmatpush.bf16.msrb.mxu2 %v3987_v51  ;;  %2617 = vmatpush.bf16.msrb.mxu3 %v4051_v56  ;;  %v4015_v51 = vor.u32 %v4360_v48, %v4014_v44 }
 0x2fa   : > { %2576 = vmatpush.bf16.msra.mxu0 %v3975_v57  ;;  %2590 = vmatpush.bf16.msra.mxu1 %v4039_v63  ;;  %v4342_v57 = vld [vmem:[#allocation2 + $0x524] sm:$0xf0]  ;;  %v3944_v63 = vld [vmem:[#allocation2 + $0x528] sm:$0xf0] }
 0x2fb   : > { %2604 = vmatpush.bf16.msrb.mxu2 %v3979_v12  ;;  %2618 = vmatpush.bf16.msrb.mxu3 %v4043_v27  ;;  %v4007_v12 = vor.u32 %v4358_v60, %v4006_v58  ;;  %v4008_v27 = vld [vmem:[#allocation2 + $0x5a8] sm:$0xf0] }
 0x2fc   : > { %v4011_v35 = vor.u32 %v4357_v24, %v4008_v27 }
 0x2fe   : > { %2577 = vmatpush.bf16.msra.mxu0 %v3967_v10  ;;  %2591 = vmatpush.bf16.msra.mxu1 %v4031_v11 }
 0x2ff   : > { %2605 = vmatpush.bf16.msrb.mxu2 %v3971_v32  ;;  %2619 = vmatpush.bf16.msrb.mxu3 %v4035_v14  ;;  %v3936_v32 = vld [vmem:[#allocation2 + $0x518] sm:$0xf0] }
 0x300   : > { %v3939_v21 = vor.u32 %v4339_v13, %v3936_v32 }
 0x302   : > { %2578 = vmatpush.bf16.msra.mxu0 %v3959_v26  ;;  %2592 = vmatpush.bf16.msra.mxu1 %v4023_v16  ;;  %v3992_v16 = vld [vmem:[#allocation2 + $0x588] sm:$0xf0] }
 0x303   : > { %2606 = vmatpush.bf16.msrb.mxu2 %v3963_v34 }
 0x306   : > { %2593 = vmatpush.bf16.msra.mxu1 %v4015_v51 }
 0x307   : > { %2607 = vmatpush.bf16.msrb.mxu2 %v3955_v52 }
 0x30a   : > { %2594 = vmatpush.bf16.msra.mxu1 %v4007_v12 }
 0x30e   : > { %2595 = vmatpush.bf16.msra.mxu1 %v3999_v19 }
 0x341   : > { %v1743_v55 = vpop.f32.mrf.mxu0 }
 0x342   : > { %v1757_v62 = vpop.f32.mrf.mxu1 }
 0x343   : > { %v1758_v1 = vadd.f32 %v1757_v62, %v1743_v55  ;;  %v4341_v62 = vld [vmem:[#allocation2 + $0x524] sm:$0xf] }
 0x344   : > { %v3947_v4 = vor.u32 %v4341_v62, %v3944_v63 }
 0x345   : > { %v4955_v9 = vadd.f32 %v1758_v1, %v4929_v8  ;;  %v1204_v8 = vadd.f32 %v1198_v47, %v4917_v33  ;;  %v4027_v33 = vor.u32 %v4361_v36, %v4024_v39  ;;  %v3950_v47 = vld [vmem:[#allocation2 + $0x530] sm:$0xf]  ;;  %v3943_v1 = vor.u32 %v4342_v57, %v3942_v54 }
 0x346   : > { %v3951_v46 = vor.u32 %v4344_v43, %v3950_v47  ;;  %2608 = vmatpush.bf16.msrb.mxu2 %v3947_v4 }
 0x347   : > { %v1771_v37 = vpop.f32.mrf.mxu2  ;;  %v1457_v40 = vadd.f32 %v1425_v59, %v1204_v8  ;;  %2620 = vmatpush.bf16.msrb.mxu3 %v4027_v33  ;;  %v4355_v59 = vld [vmem:[#allocation2 + $0x594] sm:$0xf]  ;;  %v4338_v8 = vld [vmem:[#allocation2 + $0x504] sm:$0xf0] }
 0x348   : > { %v1785_v18 = vpop.f32.mrf.mxu3  ;;  %2579 = vmatpush.bf16.msra.mxu0 %v3951_v46  ;;  %v3927_v36 = vor.u32 %v4338_v8, %v3926_v20 }
 0x349   : > { %v1786_v22 = vadd.f32 %v1785_v18, %v1771_v37  ;;  %v1745_v25 = vpop.f32.mrf.mxu0  ;;  %v4000_v37 = vld [vmem:[#allocation2 + $0x598] sm:$0xf0]  ;;  %v3935_v18 = vor.u32 %v4340_v5, %v3934_v2 }
 0x34a   : > { %v1759_v38 = vpop.f32.mrf.mxu1  ;;  %v4003_v26 = vor.u32 %v4355_v59, %v4000_v37  ;;  %2609 = vmatpush.bf16.msrb.mxu2 %v3939_v21 }
 0x34b   : > { %v4963_v17 = vadd.f32 %v1786_v22, %v4932_v23  ;;  %v1760_v41 = vadd.f32 %v1759_v38, %v1745_v25  ;;  %v4016_v23 = vld [vmem:[#allocation2 + $0x5b8] sm:$0xf0]  ;;  %v3990_v22 = vld [vmem:[#allocation2 + $0x580] sm:$0xf]  ;;  %v4353_v38 = vld [vmem:[#allocation2 + $0x584] sm:$0xf] }
 0x34c   : > { %v4019_v56 = vor.u32 %v4359_v53, %v4016_v23  ;;  %2580 = vmatpush.bf16.msra.mxu0 %v3943_v1  ;;  %v3995_v43 = vor.u32 %v4353_v38, %v3992_v16 }
 0x34d   : > { %v4965_v45 = vadd.f32 %v1760_v41, %v1457_v40  ;;  %v3931_v41 = vor.u32 %v4337_v28, %v3928_v29 }
 0x34e   : > { %2621 = vmatpush.bf16.msrb.mxu3 %v4019_v56 }
 0x34f   : > { %v1773_v55 = vpop.f32.mrf.mxu2  ;;  %2610 = vmatpush.bf16.msrb.mxu2 %v3931_v41 }
 0x350   : > { %v1787_v61 = vpop.f32.mrf.mxu3  ;;  %2581 = vmatpush.bf16.msra.mxu0 %v3935_v18 }
 0x351   : > { %v1788_v0 = vadd.f32 %v1787_v61, %v1773_v55  ;;  %v1996_v31 = vpop.f32.mrf.mxu0 }
 0x352   : > { %v2010_v3 = vpop.f32.mrf.mxu1  ;;  %2622 = vmatpush.bf16.msrb.mxu3 %v4011_v35 }
 0x353   : > { %v1793_v10 = vadd.f32 %v1788_v0, %v4934_v42  ;;  %v2011_v11 = vadd.f32 %v2010_v3, %v1996_v31  ;;  %v4354_v42 = vld [vmem:[#allocation2 + $0x584] sm:$0xf0] }
 0x354   : > { %v3991_v39 = vor.u32 %v4354_v42, %v3990_v22  ;;  %2582 = vmatpush.bf16.msra.mxu0 %v3927_v36 }
 0x355   : > { %v4969_v14 = vadd.f32 %v2011_v11, %v4955_v9 }
 0x356   : > { %2623 = vmatpush.bf16.msrb.mxu3 %v4003_v26  ;;  %2596 = vmatpush.bf16.msra.mxu1 %v3991_v39 }
 0x357   : > { %v2024_v25 = vpop.f32.mrf.mxu2 }
 0x358   : > { %v2038_v30 = vpop.f32.mrf.mxu3 }
 0x359   : > { %v2039_v9 = vadd.f32 %v2038_v30, %v2024_v25  ;;  %v1998_v34 = vpop.f32.mrf.mxu0 }
 0x35a   : > { %v2012_v40 = vpop.f32.mrf.mxu1  ;;  %2624 = vmatpush.bf16.msrb.mxu3 %v3995_v43 }
 0x35b   : > { %v2044_v33 = vadd.f32 %v2039_v9, %v4963_v17  ;;  %v2013_v47 = vadd.f32 %v2012_v40, %v1998_v34 }
 0x35d   : > { %v2045_v44 = vadd.f32 %v2013_v47, %v4965_v45 }
 0x35f   : > { %v2026_v46 = vpop.f32.mrf.mxu2 }
 0x360   : > { %v2040_v48 = vpop.f32.mrf.mxu3 }
 0x361   : > { %v2041_v49 = vadd.f32 %v2040_v48, %v2026_v46  ;;  %v2067_v50 = vpop.f32.mrf.mxu0 }
 0x362   : > { %v2081_v51 = vpop.f32.mrf.mxu1 }
 0x363   : > { %v2046_v52 = vadd.f32 %v2041_v49, %v1793_v10 }
 0x367   : > { %v2108_v17 = vpop.f32.mrf.mxu2 }
 0x368   : > { %v2122_v45 = vpop.f32.mrf.mxu3 }
 0x369   : > { %v2069_v53 = vpop.f32.mrf.mxu0 }
 0x36a   : > { %v2086_v23 = vpack.c.bf16 %v2069_v53, %v2067_v50  ;;  %v2083_v54 = vpop.f32.mrf.mxu1 }
 0x36b   : > { %v2087_v55 = vpack.c.bf16 %v2083_v54, %v2081_v51 }
 0x36c   : > { %2330 = vmatmul.bf16.vlgmr.msrb.gmra.mxu0 %v2086_v23  ;;  %2358 = vmatmul.bf16.vlgmr.msra.gmra.mxu2 %v2086_v23 }
 0x36d   : > { %2344 = vmatmul.bf16.vlgmr.msrb.gmra.mxu1 %v2087_v55  ;;  %2372 = vmatmul.bf16.vlgmr.msra.gmra.mxu3 %v2087_v55 }
 0x36f   : > { %v2110_v56 = vpop.f32.mrf.mxu2 }
 0x370   : > { %v2124_v57 = vpop.f32.mrf.mxu3  ;;  %v2127_v58 = vpack.c.bf16 %v2110_v56, %v2108_v17 }
 0x371   : > { %v2128_v60 = vpack.c.bf16 %v2124_v57, %v2122_v45 }
 0x37c   : > { %2583 = vmatmul.bf16.vlgmr.msra.gmra.mxu0 %v2127_v58  ;;  %2611 = vmatmul.bf16.vlgmr.msrb.gmra.mxu2 %v2127_v58 }
 0x37d   : > { %2597 = vmatmul.bf16.vlgmr.msra.gmra.mxu1 %v2128_v60  ;;  %2625 = vmatmul.bf16.vlgmr.msrb.gmra.mxu3 %v2128_v60 }
 0x3e9   : > { %v2331_v61 = vpop.f32.mrf.mxu0 }
 0x3ea   : > { %v2345_v62 = vpop.f32.mrf.mxu1 }
 0x3eb   : > { %v2346_v3 = vadd.f32 %v2345_v62, %v2331_v61  ;;  %v4376_v62 = vld [vmem:[%s5073_s5 + $0x38] sm:$0xff] }
 0x3ec   : > { %2889 = vmatpush.bf16.msrb.mxu0 %v4376_v62 }
 0x3ed   : > { %v2378_v10 = vadd.f32 %v2346_v3, %v4969_v14 }
 0x3ef   : > { %v2359_v63 = vpop.f32.mrf.mxu2 }
 0x3f0   : > { %v2373_v24 = vpop.f32.mrf.mxu3 }
 0x3f1   : > { %v2333_v0 = vpop.f32.mrf.mxu0  ;;  %v2374_v35 = vadd.f32 %v2373_v24, %v2359_v63  ;;  %v4384_v63 = vld [vmem:[%s5073_s5 + $0x78] sm:$0xff]  ;;  %v4375_v24 = vld [vmem:[%s5073_s5 + $0x30] sm:$0xff] }
 0x3f2   : > { %v2347_v31 = vpop.f32.mrf.mxu1  ;;  %2903 = vmatpush.bf16.msrb.mxu1 %v4384_v63  ;;  %2890 = vmatpush.bf16.msrb.mxu0 %v4375_v24 }
 0x3f3   : > { %v2348_v4 = vadd.f32 %v2347_v31, %v2333_v0  ;;  %v2379_v21 = vadd.f32 %v2374_v35, %v2044_v33  ;;  %v4383_v0 = vld [vmem:[%s5073_s5 + $0x70] sm:$0xff]  ;;  %v4374_v31 = vld [vmem:[%s5073_s5 + $0x28] sm:$0xff] }
 0x3f5   : > { %v2380_v32 = vadd.f32 %v2348_v4, %v2045_v44 }
 0x3f6   : > { %2904 = vmatpush.bf16.msrb.mxu1 %v4383_v0  ;;  %2891 = vmatpush.bf16.msrb.mxu0 %v4374_v31 }
 0x3f7   : > { %v2361_v1 = vpop.f32.mrf.mxu2 }
 0x3f8   : > { %v2375_v12 = vpop.f32.mrf.mxu3 }
 0x3f9   : > { %v2584_v27 = vpop.f32.mrf.mxu0  ;;  %v2376_v19 = vadd.f32 %v2375_v12, %v2361_v1  ;;  %v4382_v1 = vld [vmem:[%s5073_s5 + $0x68] sm:$0xff]  ;;  %v4373_v12 = vld [vmem:[%s5073_s5 + $0x20] sm:$0xff] }
 0x3fa   : > { %v2598_v2 = vpop.f32.mrf.mxu1  ;;  %2905 = vmatpush.bf16.msrb.mxu1 %v4382_v1  ;;  %2892 = vmatpush.bf16.msrb.mxu0 %v4373_v12 }
 0x3fb   : > { %v2599_v5 = vadd.f32 %v2598_v2, %v2584_v27  ;;  %v2381_v26 = vadd.f32 %v2376_v19, %v2046_v52  ;;  %v4381_v27 = vld [vmem:[%s5073_s5 + $0x60] sm:$0xff] }
 0x3fd   : > { %v4974_v59 = vadd.f32 %v2599_v5, %v2378_v10  ;;  %v4380_v10 = vld [vmem:[%s5073_s5 + $0x58] sm:$0xff] }
 0x3fe   : > { %2906 = vmatpush.bf16.msrb.mxu1 %v4381_v27 }
 0x3ff   : > { %v2612_v6 = vpop.f32.mrf.mxu2  ;;  %v2653_v8 = vmul.f32 %v4974_v59, %v4974_v59 }
 0x400   : > { %v2626_v7 = vpop.f32.mrf.mxu3 }
 0x401   : > { %v2586_v11 = vpop.f32.mrf.mxu0  ;;  %v2627_v18 = vadd.f32 %v2626_v7, %v2612_v6  ;;  %v4372_v7 = vld [vmem:[%s5073_s5 + $0x18] sm:$0xff] }
 0x402   : > { %v2600_v13 = vpop.f32.mrf.mxu1  ;;  %2893 = vmatpush.bf16.msrb.mxu0 %v4372_v7  ;;  %2907 = vmatpush.bf16.msrb.mxu1 %v4380_v10  ;;  %v4407_v7 = vld [vmem:[%s5075_s7] ss:$0 sm:$0xff] }
 0x403   : > { %v2601_v37 = vadd.f32 %v2600_v13, %v2586_v11  ;;  %v4982_v14 = vadd.f32 %v2627_v18, %v2379_v21  ;;  %v4371_v13 = vld [vmem:[%s5073_s5 + $0x10] sm:$0xff] }
 0x405   : > { %v4976_v20 = vadd.f32 %v2601_v37, %v2380_v32  ;;  %v2654_v9 = vmul.f32 %v4982_v14, %v4982_v14  ;;  %v4379_v32 = vld [vmem:[%s5073_s5 + $0x50] sm:$0xff] }
 0x406   : > { %2894 = vmatpush.bf16.msrb.mxu0 %v4371_v13  ;;  %2908 = vmatpush.bf16.msrb.mxu1 %v4379_v32 }
 0x407   : > { %v2655_v22 = vmul.f32 %v4976_v20, %v4976_v20  ;;  %v2614_v42 = vpop.f32.mrf.mxu2  ;;  %v2639_v28 = vadd.f32 %v4976_v20, %v4974_v59 }
 0x408   : > { %v2628_v25 = vpop.f32.mrf.mxu3 }
 0x409   : > { %v2629_v29 = vadd.f32 %v2628_v25, %v2614_v42  ;;  %v2657_v30 = vadd.f32 %v2655_v22, %v2653_v8  ;;  %v2640_v40 = vrot.slane %v2639_v28, 4  ;;  %v4370_v22 = vld [vmem:[%s5073_s5 + $0x8] sm:$0xff] }
 0x40a   : > { %v4378_v42 = vld [vmem:[%s5073_s5 + $0x48] sm:$0xff]  ;;  %2895 = vmatpush.bf16.msrb.mxu0 %v4370_v22 }
 0x40b   : > { %v4986_v38 = vadd.f32 %v2629_v29, %v2381_v26  ;;  %v2658_v16 = vrot.slane %v2657_v30, 4  ;;  %v2641_v48 = vadd.f32 %v2640_v40, %v2639_v28  ;;  %2909 = vmatpush.bf16.msrb.mxu1 %v4378_v42  ;;  %v4369_v26 = vld [vmem:[%s5073_s5] sm:$0xff] }
 0x40d   : > { %v2656_v34 = vmul.f32 %v4986_v38, %v4986_v38  ;;  %v2659_v36 = vadd.f32 %v2658_v16, %v2657_v30  ;;  %v2646_v39 = vadd.f32 %v4986_v38, %v4982_v14  ;;  %v2642_v54 = vrot.slane %v2641_v48, 2 }
 0x40e   : > { %2896 = vmatpush.bf16.msrb.mxu0 %v4369_v26 }
 0x40f   : > { %v2660_v41 = vrot.slane %v2659_v36, 2  ;;  %v2647_v33 = vrot.slane %v2646_v39, 4  ;;  %v2664_v47 = vadd.f32 %v2656_v34, %v2654_v9  ;;  %v2643_v57 = vadd.f32 %v2642_v54, %v2641_v48 }
 0x411   : > { %v2661_v43 = vadd.f32 %v2660_v41, %v2659_v36  ;;  %v2648_v44 = vadd.f32 %v2647_v33, %v2646_v39  ;;  %v2665_v46 = vrot.slane %v2664_v47, 4  ;;  %v2644_v60 = vrot.slane %v2643_v57, 1  ;;  %v4052_v36 = vld [vmem:[%s5074_s6 + $0x4] ss:$8 sm:$0x3] }
 0x412   : > { %v2715_v33 = vperm.slane %v4052_v36, 1 }
 0x413   : > { %v2662_v49 = vrot.slane %v2661_v43, 1  ;;  %v2649_v50 = vrot.slane %v2648_v44, 2  ;;  %v2666_v51 = vadd.f32 %v2665_v46, %v2664_v47  ;;  %v2645_v61 = vadd.f32 %v2644_v60, %v2643_v57 }
 0x415   : > { %v2663_v52 = vadd.f32 %v2662_v49, %v2661_v43  ;;  %v2650_v53 = vadd.f32 %v2649_v50, %v2648_v44  ;;  %v2667_v23 = vrot.slane %v2666_v51, 2  ;;  %v2714_v49 = vperm.slane %v4052_v36, 0 }
 0x417   : > { %2675 = vadd.xlane.f32.xlu1 %v2663_v52  ;;  %v2651_v55 = vrot.slane %v2650_v53, 1  ;;  %v2668_v17 = vadd.f32 %v2667_v23, %v2666_v51  ;;  %v4053_v23 = vld [vmem:[%s5074_s6 + $0x5] ss:$8 sm:$0x3] }
 0x419   : > { %v2652_v45 = vadd.f32 %v2651_v55, %v2650_v53  ;;  %v2669_v56 = vrot.slane %v2668_v17, 1 }
 0x41b   : > { %2673 = vadd.xlane.f32.xlu2 %v2652_v45  ;;  %v2670_v58 = vadd.f32 %v2669_v56, %v2668_v17 }
 0x41d   : > { %2677 = vadd.xlane.f32.xlu0 %v2670_v58 }
 0x423   : > { %2671 = vadd.xlane.f32.xlu2 %v2645_v61 }
 0x48a   : > { %v2676_v37 = vpop.xlane.xlu1 %2675 }
 0x48b   : > { %v2681_v21 = vmul.f32 %v2676_v37, %v4856_v15 }
 0x48e   : > { %v2674_v2 = vpop.xlane.xlu2 %2673 }
 0x48f   : > { %v2680_v3 = vmul.f32 %v2674_v2, %v4856_v15 }
 0x490   : > { %v2678_v4 = vpop.xlane.xlu0 %2677 }
 0x491   : > { %v2696_v5 = vmul.f32 %v2680_v3, %v2680_v3  ;;  %v2695_v6 = vmul.f32 %v2678_v4, %v4856_v15 }
 0x493   : > { %v2697_v11 = vsub.f32 %v2695_v6, %v2696_v5 }
 0x495   : > { %v2698_v35 = vadd.f32 1e-05, %v2697_v11 }
 0x496   : > { %v2672_v18 = vpop.xlane.xlu2 %2671 }
 0x497   : > { %4414 = vrsqrt.f32 %v2698_v35  ;;  %v2679_v19 = vmul.f32 %v2672_v18, %v4856_v15  ;;  %v4377_v15 = vld [vmem:[%s5073_s5 + $0x40] sm:$0xff]  ;;  %vm2705_vm14 = vweird.f32 %v2698_v35 }
 0x498   : > { %2910 = vmatpush.bf16.msrb.mxu1 %v4377_v15 }
 0x499   : > { %v2682_v8 = vmul.f32 %v2679_v19, %v2679_v19 }
 0x49b   : > { %v2683_v25 = vsub.f32 %v2681_v21, %v2682_v8 }
 0x49d   : > { %v4415_v28 = vpop.eup %4414  ;;  %v2684_v29 = vadd.f32 1e-05, %v2683_v25 }
 0x49e   : > { %v2700_v30 = vmul.f32 %v4415_v28, %v2698_v35  ;;  %vm2706_vm13 = vweird.f32 %v4415_v28 }
 0x49f   : > { %4416 = vrsqrt.f32 %v2684_v29  ;;  %vm2707_vm15 = vmor %vm2705_vm14, %vm2706_vm13  ;;  %vm2691_vm1 = vweird.f32 %v2684_v29 }
 0x4a0   : > { %v2701_v16 = vmul.f32 %v4415_v28, %v2700_v30 }
 0x4a2   : > { %v2702_v9 = vmul.f32 0.5, %v2701_v16 }
 0x4a4   : > { %v2703_v34 = vsub.f32 1.5, %v2702_v9 }
 0x4a5   : > { %v4417_v39 = vpop.eup %4416 }
 0x4a6   : > { %v2704_v40 = vmul.f32 %v4415_v28, %v2703_v34  ;;  %v2686_v41 = vmul.f32 %v4417_v39, %v2684_v29  ;;  %vm2692_vm0 = vweird.f32 %v4417_v39 }
 0x4a7   : > { %vm2693_vm2 = vmor %vm2691_vm1, %vm2692_vm0 }
 0x4a8   : > { %v2708_v47 = vsel %vm2707_vm15, %v4415_v28, %v2704_v40  ;;  %v2687_v43 = vmul.f32 %v4417_v39, %v2686_v41 }
 0x4a9   : > { %v2719_v46 = vmul.f32 %v2715_v33, %v2708_v47 }
 0x4aa   : > { %v2688_v44 = vmul.f32 0.5, %v2687_v43 }
 0x4ab   : > { %v2721_v51 = vmul.f32 %v2719_v46, %v2680_v3  ;;  %v2729_v55 = vperm.slane %v2719_v46, 0 }
 0x4ac   : > { %v2689_v48 = vsub.f32 1.5, %v2688_v44 }
 0x4ad   : > { %v2724_v54 = vrot.slane %v2721_v51, 7  ;;  %v2731_v58 = vmul.f32 %v2729_v55, %v4982_v14  ;;  %v2733_v60 = vmul.f32 %v2729_v55, %v4986_v38 }
 0x4ae   : > { %v2690_v50 = vmul.f32 %v4417_v39, %v2689_v48 }
 0x4b0   : > { %v2694_v52 = vsel %vm2693_vm2, %v4417_v39, %v2690_v50 }
 0x4b1   : > { %v2718_v53 = vmul.f32 %v2714_v49, %v2694_v52 }
 0x4b3   : > { %v2720_v17 = vmul.f32 %v2718_v53, %v2679_v19  ;;  %v2728_v45 = vperm.slane %v2718_v53, 0 }
 0x4b5   : > { %v2725_v56 = vsel %vm826_vm7, %v2720_v17, %v2724_v54  ;;  %v2730_v61 = vmul.f32 %v2728_v45, %v4974_v59  ;;  %v2732_v62 = vmul.f32 %v2728_v45, %v4976_v20 }
 0x4b6   : > { %v2727_v57 = vsub.f32 %v4053_v23, %v2725_v56 }
 0x4b8   : > { %v2735_v63 = vperm.slane %v2727_v57, 0  ;;  %v2736_v24 = vperm.slane %v2727_v57, 1 }
 0x4ba   : > { %v2739_v0 = vadd.f32 %v2735_v63, %v2730_v61  ;;  %v2740_v31 = vadd.f32 %v2736_v24, %v2731_v58  ;;  %v2741_v1 = vadd.f32 %v2735_v63, %v2732_v62  ;;  %v2742_v12 = vadd.f32 %v2736_v24, %v2733_v60 }
 0x4bc   : > { %vm2743_vm3 = vcmp.gt.f32.partialorder %v2739_v0, 0.0  ;;  %vm2745_vm4 = vcmp.gt.f32.partialorder %v2741_v1, 0.0  ;;  %v2747_v27 = vmul.f32 0.2, %v2739_v0  ;;  %v2749_v2 = vmul.f32 0.2, %v2741_v1 }
 0x4bd   : > { %vm2744_vm5 = vcmp.gt.f32.partialorder %v2740_v31, 0.0  ;;  %vm2746_vm6 = vcmp.gt.f32.partialorder %v2742_v12, 0.0  ;;  %v2748_v14 = vmul.f32 0.2, %v2740_v31  ;;  %v2750_v3 = vmul.f32 0.2, %v2742_v12 }
 0x4be   : > { %v2751_v38 = vsel %vm2743_vm3, %v2739_v0, %v2747_v27  ;;  %v2753_v4 = vsel %vm2745_vm4, %v2741_v1, %v2749_v2 }
 0x4bf   : > { %v2755_v59 = vpack.c.bf16 %v2753_v4, %v2751_v38  ;;  %v2752_v5 = vsel %vm2744_vm5, %v2740_v31, %v2748_v14  ;;  %v2754_v20 = vsel %vm2746_vm6, %v2742_v12, %v2750_v3 }
 0x4c0   : > { %v2756_v6 = vpack.c.bf16 %v2754_v20, %v2752_v5 }
 0x4c1   : > { %2897 = vmatmul.bf16.vlgmr.msrb.gmra.mxu0 %v2755_v59 }
 0x4c2   : > { %2911 = vmatmul.bf16.vlgmr.msrb.gmra.mxu1 %v2756_v6 }
 0x53e   : > { %v2898_v10 = vpop.f32.mrf.mxu0 }
 0x53f   : > { %v2899_v11 = vadd.f32 %v4407_v7, %v2898_v10  ;;  %v2912_v35 = vpop.f32.mrf.mxu1 }
 0x541   : > { %v2913_v13 = vadd.f32 %v2912_v35, %v2899_v11 }
 0x543   : > { %2917 = vst [vmem:[%s342_s23] sm:$0xff] %v2913_v13 }
 0x546   : > { %v2900_v32 = vpop.f32.mrf.mxu0 }
 0x547   : > { %v2901_v37 = vadd.f32 %v4407_v7, %v2900_v32  ;;  %v2914_v18 = vpop.f32.mrf.mxu1 }
 0x549   : > { %v2915_v19 = vadd.f32 %v2914_v18, %v2901_v37 }
 0x54b   : > { %2918 = vst [vmem:[%s342_s23 + $0x8] sm:$0xff] %v2915_v19 }
 0x54c PF: > { %s19_s27 = sadd.s32 1, %s4458_s27  }
 0x54d   : > { %p16_p7 = scmp.ge.s32.totalorder %s19_s27, 4  }
 0x54f   :  { %18 = sbr.rel (!%p16_p7) target bundleno = 1 (0x1), region = 107 }
 0x554   :  { %2940 = vsyncpa [#allocation3], 1 }
 0x555   :  { %2942 = vsyncpa [#allocation3 + $0x1], 1 }

</bundles_post_ra>
